<compile_context>
chip_gen: v6e
topology: v6e:2x2x1
jax: 0.10.0
libtpu: 0.0.40
codegen_flags: <defaults>
</compile_context>

<pallas_src>
import functools

import jax
import jax.numpy as jnp
from jax import lax
from jax.experimental import pallas as pl
from jax.experimental.pallas import tpu as pltpu

_LANES = 128     # lane width (last dim of every vreg tile)
_CH = 128        # rows per inner fori_loop sub-chunk (16 vregs per f32 temp)
_TR_MAX = 4096   # rows per grid block: 2 MiB/input/block, 8 MiB double-buffered
_NC = 2          # leading "parallel" grid axis -> both TensorCores on v7x


def _ceil_to(x, m):
    return -(-x // m) * m


def _cls_loss_kernel(pred_ref, iou_ref, sum_out, cnt_out, sum_acc, cnt_acc, *,
                     n, nb, spc, tr, ch, pos_lb, neg_ub, disjoint, has_tail):
    c = pl.program_id(0)          # parallel axis (core id on v7x megacore)
    j = pl.program_id(1)          # per-core sequential step
    b = c * spc + j               # logical row-block id

    @pl.when(j == 0)
    def _():
        sum_acc[...] = jnp.zeros_like(sum_acc)
        cnt_acc[...] = jnp.zeros_like(cnt_acc)

    n_chunks = tr // ch

    def accumulate(masked):
        def body(k, carry):
            s, ct = carry
            r0 = pl.multiple_of(k * ch, ch)
            p = pred_ref[pl.ds(r0, ch), :]        # (ch, 128) scores in (0,1)
            u = iou_ref[pl.ds(r0, ch), :]         # (ch, 128) max IoU
            pos = u >= pos_lb
            neg = u <= neg_ub
            if masked:
                # Only the single block containing padding pays for this.
                row = lax.broadcasted_iota(jnp.int32, (ch, _LANES), 0)
                lane = lax.broadcasted_iota(jnp.int32, (ch, _LANES), 1)
                valid = (row + b * tr + r0) * _LANES + lane < n
                pos = pos & valid
                neg = neg & valid
            either = pos | neg
            if disjoint:
                # pos/neg cannot overlap: one log per element, one count op.
                sel = jnp.where(pos, p, 1.0 - p)
                cnt_e = either.astype(jnp.float32)
            else:
                # Overlapping thresholds: fold both BCE terms into one log via
                # -log(p*(1-p)) = -log p - log(1-p).  Differs from torch's
                # per-term -100 clamp only when p < e^-100 (never for sigmoid).
                sel = jnp.where(pos & neg, p * (1.0 - p),
                                jnp.where(pos, p, 1.0 - p))
                cnt_e = pos.astype(jnp.float32) + neg.astype(jnp.float32)
            # BCELoss clamp.  We accumulate +log and negate once in the
            # wrapper (saves one VPU op/element).  jnp.where is a select, so
            # NaN/Inf from garbage rows in the unselected branch never leaks.
            log_sel = jnp.maximum(jnp.log(sel), -100.0)
            contrib = jnp.where(either, log_sel, 0.0)
            s = s + jnp.sum(contrib.reshape(ch // 8, 8, _LANES), axis=0)
            ct = ct + jnp.sum(cnt_e.reshape(ch // 8, 8, _LANES), axis=0)
            return s, ct

        s, ct = lax.fori_loop(0, n_chunks, body,
                              (sum_acc[...], cnt_acc[...]),
                              unroll=min(8, n_chunks))
        sum_acc[...] = s
        cnt_acc[...] = ct

    last_b = nb - 1
    if has_tail:
        @pl.when(b == last_b)      # the single block containing padding
        def _():
            accumulate(True)

        @pl.when(b < last_b)       # full blocks: no iota / compare-vs-n work
        def _():
            accumulate(False)
        # b > last_b (overshoot steps of the last core): skip entirely.
    elif _NC * spc > nb:
        @pl.when(b <= last_b)
        def _():
            accumulate(False)
    else:
        accumulate(False)

    @pl.when(j == spc - 1)
    def _():
        sum_out[0] = sum_acc[...]
        cnt_out[0] = cnt_acc[...]


def classification_loss_aligned(pred2d, iou2d, n, config):
    """Fast path: pred2d/iou2d are (rows, 128) float32; the first `n` elements
    in row-major order are valid.  No host-side copies of the inputs."""
    rows = int(pred2d.shape[0])
    assert pred2d.shape == (rows, _LANES) and iou2d.shape == (rows, _LANES)
    assert 0 < n <= rows * _LANES

    pos_lb = float(config['positive_cls_lb'])
    neg_ub = float(config['negative_cls_ub'])
    disjoint = pos_lb > neg_ub          # config-gated single-log fast path

    tr = min(_TR_MAX, _ceil_to(rows, _CH))   # rows per grid block
    nb = -(-rows // tr)                      # number of logical row blocks
    spc = -(-nb // _NC)                      # sequential steps per core
    has_tail = nb * tr * _LANES > n          # any padding/garbage anywhere?

    kernel = functools.partial(
        _cls_loss_kernel, n=n, nb=nb, spc=spc, tr=tr, ch=min(_CH, tr),
        pos_lb=pos_lb, neg_ub=neg_ub, disjoint=disjoint, has_tail=has_tail)

    def in_map(c, j):
        # Clamp overshoot steps of the last core onto a valid block; their
        # compute is skipped inside the kernel, only the DMA is redundant.
        return (jnp.minimum(c * spc + j, nb - 1), 0)

    sums, cnts = pl.pallas_call(
        kernel,
        out_shape=(jax.ShapeDtypeStruct((_NC, 8, _LANES), jnp.float32),
                   jax.ShapeDtypeStruct((_NC, 8, _LANES), jnp.float32)),
        grid_spec=pltpu.PrefetchScalarGridSpec(
            num_scalar_prefetch=0,
            grid=(_NC, spc),
            in_specs=[pl.BlockSpec((tr, _LANES), in_map),
                      pl.BlockSpec((tr, _LANES), in_map)],
            out_specs=[pl.BlockSpec((1, 8, _LANES), lambda c, j: (c, 0, 0)),
                       pl.BlockSpec((1, 8, _LANES), lambda c, j: (c, 0, 0))],
            scratch_shapes=[pltpu.VMEM((8, _LANES), jnp.float32),   # log sums
                            pltpu.VMEM((8, _LANES), jnp.float32)],  # counts
        ),
        compiler_params=pltpu.CompilerParams(
            dimension_semantics=("parallel", "arbitrary")),
    )(pred2d, iou2d)

    # Kernel accumulates +log; negate here.  NOTE: count == 0 yields NaN (0/0),
    # matching torch BCELoss(mean) over an empty gather.
    return -jnp.sum(sums) / jnp.sum(cnts)


def classification_loss(pred, iou, config):
    """Module-equivalent API: pred (N,) or (N,1) scores in (0,1); iou (N,)."""
    pred_flat = jnp.asarray(pred, jnp.float32).reshape(-1)
    iou_flat = jnp.asarray(iou, jnp.float32).reshape(-1)
    n = int(pred_flat.shape[0])
    assert int(iou_flat.shape[0]) == n, "pred must be one score per proposal"

    rows = -(-n // _LANES)
    if n % _LANES:
        # TODO(synk): compat path — have the producer emit a lane-aligned
        # (rows, 128) buffer so this full-array pad copy disappears.
        pad = rows * _LANES - n
        pred_flat = jnp.pad(pred_flat, (0, pad))
        iou_flat = jnp.pad(iou_flat, (0, pad))
    pred2d = pred_flat.reshape(rows, _LANES)
    iou2d = iou_flat.reshape(rows, _LANES)
    return classification_loss_aligned(pred2d, iou2d, n, config)


def _reference_loss(pred, iou, config):
    """Pure-JAX reference of the PyTorch module (per-term -100 log clamp)."""
    u = jnp.asarray(iou, jnp.float32).reshape(-1)
    p = jnp.asarray(pred, jnp.float32).reshape(-1)
    pos = u >= config['positive_cls_lb']
    neg = u <= config['negative_cls_ub']
    log_p = jnp.maximum(jnp.log(p), -100.0)
    log_1mp = jnp.maximum(jnp.log(1.0 - p), -100.0)
    num = (jnp.sum(jnp.where(pos, -log_p, 0.0)) +
           jnp.sum(jnp.where(neg, -log_1mp, 0.0)))
    den = jnp.sum(pos) + jnp.sum(neg)
    return num / den


if __name__ == "__main__":
    config = {'positive_cls_lb': 0.6, 'negative_cls_ub': 0.45}

    key = jax.random.PRNGKey(0)
    k1, k2, k3, k4, k5, k6 = jax.random.split(key, 6)

    # --- Test 1: small N, not a multiple of 128 (tail-masked single block) ---
    N = 300
    pred = jax.nn.sigmoid(jax.random.normal(k1, (N, 1), jnp.float32))
    iou = jax.random.uniform(k2, (N,), jnp.float32)
    loss = jax.block_until_ready(classification_loss(pred, iou, config))
    ref = _reference_loss(pred, iou, config)
    assert jnp.allclose(loss, ref, rtol=1e-5, atol=1e-5), (loss, ref)

    # --- Test 2: large N (multiple of 128 -> zero-copy layout), multi-block:
    #     exercises the two-core split, the ragged final block (masked path)
    #     and the overshoot-skip path (nb=3, spc=2) ---------------------------
    N2 = 10240 * _LANES
    pred2 = jax.nn.sigmoid(jax.random.normal(k3, (N2,), jnp.float32))
    iou2 = jax.random.uniform(k4, (N2,), jnp.float32)
    loss2 = jax.block_until_ready(classification_loss(pred2, iou2, config))
    ref2 = _reference_loss(pred2, iou2, config)
    assert jnp.allclose(loss2, ref2, rtol=1e-4, atol=1e-5), (loss2, ref2)

    # --- Test 3: exact multiple of the 4096-row tile (no tail anywhere) ------
    N3 = 2 * _TR_MAX * _LANES
    pred3 = jax.nn.sigmoid(jax.random.normal(k5, (N3,), jnp.float32))
    iou3 = jax.random.uniform(k6, (N3,), jnp.float32)
    loss3 = jax.block_until_ready(classification_loss(pred3, iou3, config))
    ref3 = _reference_loss(pred3, iou3, config)
    assert jnp.allclose(loss3, ref3, rtol=1e-4, atol=1e-5), (loss3, ref3)

    # --- Test 4: overlapping thresholds -> fused-log non-disjoint path -------
    config_ovl = {'positive_cls_lb': 0.4, 'negative_cls_ub': 0.5}
    loss4 = jax.block_until_ready(classification_loss(pred, iou, config_ovl))
    ref4 = _reference_loss(pred, iou, config_ovl)
    assert jnp.allclose(loss4, ref4, rtol=1e-5, atol=1e-5), (loss4, ref4)

    print("KERNEL_OK")
</pallas_src>

<mosaic_0001>
module attributes {stable_mosaic.version = 11 : i64} {
  func.func @_cls_loss_kernel(%arg0: i32, %arg1: i32, %arg2: memref<128x128xf32, #tpu.memory_space<vmem>>, %arg3: memref<128x128xf32, #tpu.memory_space<vmem>>, %arg4: memref<1x8x128xf32, #tpu.memory_space<vmem>>, %arg5: memref<1x8x128xf32, #tpu.memory_space<vmem>>, %arg6: memref<8x128xf32, #tpu.memory_space<vmem>>, %arg7: memref<8x128xf32, #tpu.memory_space<vmem>>) attributes {dimension_semantics = [#tpu.dimension_semantics<parallel>, #tpu.dimension_semantics<arbitrary>], iteration_bounds = array<i64: 2, 1>, scalar_prefetch = 0 : i64, scratch_operands = 2 : i64, tpu.core_type = #tpu.core_type<tc>, window_params = [{transform_indices = @transform_0, window_bounds = array<i64: 128, 128>}, {transform_indices = @transform_1, window_bounds = array<i64: 128, 128>}, {transform_indices = @transform_2, window_bounds = array<i64: 1, 8, 128>}, {transform_indices = @transform_3, window_bounds = array<i64: 1, 8, 128>}]} {
    %c1_i32 = arith.constant 1 : i32
    %0 = arith.muli %arg0, %c1_i32 : i32
    %1 = arith.addi %0, %arg1 : i32
    %c0_i32 = arith.constant 0 : i32
    %2 = arith.cmpi eq, %arg1, %c0_i32 : i32
    %3 = arith.extui %2 : i1 to i32
    %c0_i32_0 = arith.constant 0 : i32
    %4 = arith.cmpi ne, %3, %c0_i32_0 : i32
    scf.if %4 {
      %cst = arith.constant 0.000000e+00 : f32
      %14 = vector.broadcast %cst : f32 to vector<8x128xf32>
      %c0 = arith.constant 0 : index
      %c0_7 = arith.constant 0 : index
      %15 = vector.load %arg6[%c0, %c0_7] : memref<8x128xf32, #tpu.memory_space<vmem>>, vector<8x128xf32>
      tpu.vector_store %arg6[%c0, %c0_7], %14 {strides = array<i32>} : memref<8x128xf32, #tpu.memory_space<vmem>>, vector<8x128xf32>,
      %cst_8 = arith.constant 0.000000e+00 : f32
      %16 = vector.broadcast %cst_8 : f32 to vector<8x128xf32>
      %c0_9 = arith.constant 0 : index
      %c0_10 = arith.constant 0 : index
      %17 = vector.load %arg7[%c0_9, %c0_10] : memref<8x128xf32, #tpu.memory_space<vmem>>, vector<8x128xf32>
      tpu.vector_store %arg7[%c0_9, %c0_10], %16 {strides = array<i32>} : memref<8x128xf32, #tpu.memory_space<vmem>>, vector<8x128xf32>,
    } else {
    }
    %c0_i32_1 = arith.constant 0 : i32
    %5 = arith.cmpi eq, %1, %c0_i32_1 : i32
    %6 = arith.extui %5 : i1 to i32
    %c0_i32_2 = arith.constant 0 : i32
    %7 = arith.cmpi ne, %6, %c0_i32_2 : i32
    scf.if %7 {
      %c0 = arith.constant 0 : index
      %c0_7 = arith.constant 0 : index
      %14 = vector.load %arg6[%c0, %c0_7] : memref<8x128xf32, #tpu.memory_space<vmem>>, vector<8x128xf32>
      %c0_8 = arith.constant 0 : index
      %c0_9 = arith.constant 0 : index
      %15 = vector.load %arg7[%c0_8, %c0_9] : memref<8x128xf32, #tpu.memory_space<vmem>>, vector<8x128xf32>
      %c0_i32_10 = arith.constant 0 : i32
      %c128_i32 = arith.constant 128 : i32
      %16 = arith.muli %c0_i32_10, %c128_i32 : i32
      %17 = tpu.assume_multiple %16, 128 : i32
      %18 = arith.index_cast %17 : i32 to index
      %c0_11 = arith.constant 0 : index
      %19 = vector.load %arg2[%18, %c0_11] : memref<128x128xf32, #tpu.memory_space<vmem>>, vector<128x128xf32>
      %20 = arith.index_cast %17 : i32 to index
      %c0_12 = arith.constant 0 : index
      %21 = vector.load %arg3[%20, %c0_12] : memref<128x128xf32, #tpu.memory_space<vmem>>, vector<128x128xf32>
      %cst = arith.constant 6.000000e-01 : f32
      %22 = vector.broadcast %cst : f32 to vector<128x128xf32>
      %23 = arith.cmpf oge, %21, %22 : vector<128x128xf32>
      %cst_13 = arith.constant 4.500000e-01 : f32
      %24 = vector.broadcast %cst_13 : f32 to vector<128x128xf32>
      %25 = arith.cmpf ole, %21, %24 : vector<128x128xf32>
      %26 = tpu.iota {dimensions = array<i32: 0>} : vector<128x128xi32>
      %27 = tpu.iota {dimensions = array<i32: 1>} : vector<128x128xi32>
      %c128_i32_14 = arith.constant 128 : i32
      %28 = arith.muli %1, %c128_i32_14 : i32
      %29 = vector.broadcast %28 : i32 to vector<128x128xi32>
      %30 = arith.addi %26, %29 : vector<128x128xi32>
      %31 = vector.broadcast %17 : i32 to vector<128x128xi32>
      %32 = arith.addi %30, %31 : vector<128x128xi32>
      %c128_i32_15 = arith.constant 128 : i32
      %33 = vector.broadcast %c128_i32_15 : i32 to vector<128x128xi32>
      %34 = arith.muli %32, %33 : vector<128x128xi32>
      %35 = arith.addi %34, %27 : vector<128x128xi32>
      %c300_i32 = arith.constant 300 : i32
      %36 = vector.broadcast %c300_i32 : i32 to vector<128x128xi32>
      %37 = arith.cmpi slt, %35, %36 : vector<128x128xi32>
      %38 = arith.andi %23, %37 : vector<128x128xi1>
      %39 = arith.andi %25, %37 : vector<128x128xi1>
      %40 = arith.ori %38, %39 : vector<128x128xi1>
      %cst_16 = arith.constant 1.000000e+00 : f32
      %41 = vector.broadcast %cst_16 : f32 to vector<128x128xf32>
      %42 = arith.subf %41, %19 : vector<128x128xf32>
      %43 = arith.select %38, %19, %42 : vector<128x128xi1>, vector<128x128xf32>
      %44 = arith.extui %40 : vector<128x128xi1> to vector<128x128xi32>
      %45 = arith.sitofp %44 : vector<128x128xi32> to vector<128x128xf32>
      %46 = math.log %43 : vector<128x128xf32>
      %cst_17 = arith.constant -1.000000e+02 : f32
      %47 = vector.broadcast %cst_17 : f32 to vector<128x128xf32>
      %48 = arith.maximumf %46, %47 : vector<128x128xf32>
      %cst_18 = arith.constant 0.000000e+00 : f32
      %49 = vector.broadcast %cst_18 : f32 to vector<128x128xf32>
      %50 = arith.select %40, %48, %49 : vector<128x128xi1>, vector<128x128xf32>
      %51 = vector.shape_cast %50 : vector<128x128xf32> to vector<16x8x128xf32>
      %cst_19 = arith.constant dense<0.000000e+00> : vector<8x128xf32>
      %52 = vector.multi_reduction <add>, %51, %cst_19 [0] : vector<16x8x128xf32> to vector<8x128xf32>
      %53 = arith.addf %14, %52 : vector<8x128xf32>
      %54 = vector.shape_cast %45 : vector<128x128xf32> to vector<16x8x128xf32>
      %cst_20 = arith.constant dense<0.000000e+00> : vector<8x128xf32>
      %55 = vector.multi_reduction <add>, %54, %cst_20 [0] : vector<16x8x128xf32> to vector<8x128xf32>
      %56 = arith.addf %15, %55 : vector<8x128xf32>
      %c1_i32_21 = arith.constant 1 : i32
      %c0_22 = arith.constant 0 : index
      %c0_23 = arith.constant 0 : index
      %57 = vector.load %arg6[%c0_22, %c0_23] : memref<8x128xf32, #tpu.memory_space<vmem>>, vector<8x128xf32>
      tpu.vector_store %arg6[%c0_22, %c0_23], %53 {strides = array<i32>} : memref<8x128xf32, #tpu.memory_space<vmem>>, vector<8x128xf32>,
      %c0_24 = arith.constant 0 : index
      %c0_25 = arith.constant 0 : index
      %58 = vector.load %arg7[%c0_24, %c0_25] : memref<8x128xf32, #tpu.memory_space<vmem>>, vector<8x128xf32>
      tpu.vector_store %arg7[%c0_24, %c0_25], %56 {strides = array<i32>} : memref<8x128xf32, #tpu.memory_space<vmem>>, vector<8x128xf32>,
    } else {
    }
    %c0_i32_3 = arith.constant 0 : i32
    %8 = arith.cmpi slt, %1, %c0_i32_3 : i32
    %9 = arith.extui %8 : i1 to i32
    %c0_i32_4 = arith.constant 0 : i32
    %10 = arith.cmpi ne, %9, %c0_i32_4 : i32
    scf.if %10 {
      %c0 = arith.constant 0 : index
      %c0_7 = arith.constant 0 : index
      %14 = vector.load %arg6[%c0, %c0_7] : memref<8x128xf32, #tpu.memory_space<vmem>>, vector<8x128xf32>
      %c0_8 = arith.constant 0 : index
      %c0_9 = arith.constant 0 : index
      %15 = vector.load %arg7[%c0_8, %c0_9] : memref<8x128xf32, #tpu.memory_space<vmem>>, vector<8x128xf32>
      %c0_i32_10 = arith.constant 0 : i32
      %c128_i32 = arith.constant 128 : i32
      %16 = arith.muli %c0_i32_10, %c128_i32 : i32
      %17 = tpu.assume_multiple %16, 128 : i32
      %18 = arith.index_cast %17 : i32 to index
      %c0_11 = arith.constant 0 : index
      %19 = vector.load %arg2[%18, %c0_11] : memref<128x128xf32, #tpu.memory_space<vmem>>, vector<128x128xf32>
      %20 = arith.index_cast %17 : i32 to index
      %c0_12 = arith.constant 0 : index
      %21 = vector.load %arg3[%20, %c0_12] : memref<128x128xf32, #tpu.memory_space<vmem>>, vector<128x128xf32>
      %cst = arith.constant 6.000000e-01 : f32
      %22 = vector.broadcast %cst : f32 to vector<128x128xf32>
      %23 = arith.cmpf oge, %21, %22 : vector<128x128xf32>
      %cst_13 = arith.constant 4.500000e-01 : f32
      %24 = vector.broadcast %cst_13 : f32 to vector<128x128xf32>
      %25 = arith.cmpf ole, %21, %24 : vector<128x128xf32>
      %26 = arith.ori %23, %25 : vector<128x128xi1>
      %cst_14 = arith.constant 1.000000e+00 : f32
      %27 = vector.broadcast %cst_14 : f32 to vector<128x128xf32>
      %28 = arith.subf %27, %19 : vector<128x128xf32>
      %29 = arith.select %23, %19, %28 : vector<128x128xi1>, vector<128x128xf32>
      %30 = arith.extui %26 : vector<128x128xi1> to vector<128x128xi32>
      %31 = arith.sitofp %30 : vector<128x128xi32> to vector<128x128xf32>
      %32 = math.log %29 : vector<128x128xf32>
      %cst_15 = arith.constant -1.000000e+02 : f32
      %33 = vector.broadcast %cst_15 : f32 to vector<128x128xf32>
      %34 = arith.maximumf %32, %33 : vector<128x128xf32>
      %cst_16 = arith.constant 0.000000e+00 : f32
      %35 = vector.broadcast %cst_16 : f32 to vector<128x128xf32>
      %36 = arith.select %26, %34, %35 : vector<128x128xi1>, vector<128x128xf32>
      %37 = vector.shape_cast %36 : vector<128x128xf32> to vector<16x8x128xf32>
      %cst_17 = arith.constant dense<0.000000e+00> : vector<8x128xf32>
      %38 = vector.multi_reduction <add>, %37, %cst_17 [0] : vector<16x8x128xf32> to vector<8x128xf32>
      %39 = arith.addf %14, %38 : vector<8x128xf32>
      %40 = vector.shape_cast %31 : vector<128x128xf32> to vector<16x8x128xf32>
      %cst_18 = arith.constant dense<0.000000e+00> : vector<8x128xf32>
      %41 = vector.multi_reduction <add>, %40, %cst_18 [0] : vector<16x8x128xf32> to vector<8x128xf32>
      %42 = arith.addf %15, %41 : vector<8x128xf32>
      %c1_i32_19 = arith.constant 1 : i32
      %c0_20 = arith.constant 0 : index
      %c0_21 = arith.constant 0 : index
      %43 = vector.load %arg6[%c0_20, %c0_21] : memref<8x128xf32, #tpu.memory_space<vmem>>, vector<8x128xf32>
      tpu.vector_store %arg6[%c0_20, %c0_21], %39 {strides = array<i32>} : memref<8x128xf32, #tpu.memory_space<vmem>>, vector<8x128xf32>,
      %c0_22 = arith.constant 0 : index
      %c0_23 = arith.constant 0 : index
      %44 = vector.load %arg7[%c0_22, %c0_23] : memref<8x128xf32, #tpu.memory_space<vmem>>, vector<8x128xf32>
      tpu.vector_store %arg7[%c0_22, %c0_23], %42 {strides = array<i32>} : memref<8x128xf32, #tpu.memory_space<vmem>>, vector<8x128xf32>,
    } else {
    }
    %c0_i32_5 = arith.constant 0 : i32
    %11 = arith.cmpi eq, %arg1, %c0_i32_5 : i32
    %12 = arith.extui %11 : i1 to i32
    %c0_i32_6 = arith.constant 0 : i32
    %13 = arith.cmpi ne, %12, %c0_i32_6 : i32
    scf.if %13 {
      %c0 = arith.constant 0 : index
      %c0_7 = arith.constant 0 : index
      %14 = vector.load %arg6[%c0, %c0_7] : memref<8x128xf32, #tpu.memory_space<vmem>>, vector<8x128xf32>
      %c0_8 = arith.constant 0 : index
      %c0_9 = arith.constant 0 : index
      %c0_10 = arith.constant 0 : index
      %15 = vector.load %arg4[%c0_8, %c0_9, %c0_10] : memref<1x8x128xf32, #tpu.memory_space<vmem>>, vector<1x8x128xf32>
      %16 = vector.shape_cast %15 : vector<1x8x128xf32> to vector<8x128xf32>
      %17 = vector.shape_cast %14 : vector<8x128xf32> to vector<1x8x128xf32>
      tpu.vector_store %arg4[%c0_8, %c0_9, %c0_10], %17 {strides = array<i32>} : memref<1x8x128xf32, #tpu.memory_space<vmem>>, vector<1x8x128xf32>,
      %c0_11 = arith.constant 0 : index
      %c0_12 = arith.constant 0 : index
      %18 = vector.load %arg7[%c0_11, %c0_12] : memref<8x128xf32, #tpu.memory_space<vmem>>, vector<8x128xf32>
      %c0_13 = arith.constant 0 : index
      %c0_14 = arith.constant 0 : index
      %c0_15 = arith.constant 0 : index
      %19 = vector.load %arg5[%c0_13, %c0_14, %c0_15] : memref<1x8x128xf32, #tpu.memory_space<vmem>>, vector<1x8x128xf32>
      %20 = vector.shape_cast %19 : vector<1x8x128xf32> to vector<8x128xf32>
      %21 = vector.shape_cast %18 : vector<8x128xf32> to vector<1x8x128xf32>
      tpu.vector_store %arg5[%c0_13, %c0_14, %c0_15], %21 {strides = array<i32>} : memref<1x8x128xf32, #tpu.memory_space<vmem>>, vector<1x8x128xf32>,
    } else {
    }
    return
  }
  func.func @transform_0(%arg0: i32, %arg1: i32) -> (i32, i32) {
    %c1_i32 = arith.constant 1 : i32
    %0 = arith.muli %arg0, %c1_i32 : i32
    %1 = arith.addi %0, %arg1 : i32
    %c0_i32 = arith.constant 0 : i32
    %2 = arith.minsi %1, %c0_i32 : i32
    %c0_i32_0 = arith.constant 0 : i32
    %c0_i32_1 = arith.constant 0 : i32
    return %2, %c0_i32_0 : i32, i32
  }
  func.func @transform_1(%arg0: i32, %arg1: i32) -> (i32, i32) {
    %c1_i32 = arith.constant 1 : i32
    %0 = arith.muli %arg0, %c1_i32 : i32
    %1 = arith.addi %0, %arg1 : i32
    %c0_i32 = arith.constant 0 : i32
    %2 = arith.minsi %1, %c0_i32 : i32
    %c0_i32_0 = arith.constant 0 : i32
    %c0_i32_1 = arith.constant 0 : i32
    return %2, %c0_i32_0 : i32, i32
  }
  func.func @transform_2(%arg0: i32, %arg1: i32) -> (i32, i32, i32) {
    %c0_i32 = arith.constant 0 : i32
    %c0_i32_0 = arith.constant 0 : i32
    %c0_i32_1 = arith.constant 0 : i32
    return %arg0, %c0_i32, %c0_i32_0 : i32, i32, i32
  }
  func.func @transform_3(%arg0: i32, %arg1: i32) -> (i32, i32, i32) {
    %c0_i32 = arith.constant 0 : i32
    %c0_i32_0 = arith.constant 0 : i32
    %c0_i32_1 = arith.constant 0 : i32
    return %arg0, %c0_i32, %c0_i32_0 : i32, i32, i32
  }
}

</mosaic_0001>

<bundles_post_ra>
// kernel: tpu_custom_call.1
= control target key start
LH: loop header
LB: loop body
LE: loop exit
PB: predicated region body
PF: predicated region fallthrough
CT: control target
= control target key end

     0   :  { %9 = vsyncpa [#allocation5], 0  ;;  %s2775_s0 = inlined_call_operand.hbm [shape: f32[3,128], index: 0, kind: input, shape index: {}]   ;;  %s2776_s1 = inlined_call_operand.hbm [shape: f32[3,128], index: 1, kind: input, shape index: {}]   ;;  %s2777_s2 = inlined_call_operand.hbm [shape: f32[2,8,128], index: 2, kind: output, shape index: {0}]   ;;  %s2778_s3 = inlined_call_operand.hbm [shape: f32[2,8,128], index: 3, kind: output, shape index: {1}]  }
   0x1   :  { %11 = vsyncpa [#allocation5 + $0x1], 0 }
   0x2   :  { %12 = vsyncpa [#allocation8], 0 }
   0x3   :  { %14 = vsyncpa [#allocation8 + $0x1], 0 }
   0x4   :  { %15 = vsyncpa [#allocation6], 0 }
   0x5   :  { %17 = vsyncpa [#allocation6 + $0x1], 0 }
   0x6   :  { %18 = vsyncpa [#allocation11], 0 }
   0x7   :  { %20 = vsyncpa [#allocation11 + $0x1], 0  ;;  %s1546_s12 = smov 0   ;;  %s1548_s13 = smov 0  }
   0x8   :  { %s1550_s14 = smov 0   ;;  %s1552_s15 = smov 0  }
   0x9   :  { %s1554_s16 = smov 0   ;;  %s1556_s17 = smov 0  }
   0xa   :  { %s1558_s18 = smov 0   ;;  %s1560_s19 = smov 0  }
   0xb LB: > { %s1099_s20 = sadd.s32 4294967295, %s1513_s19   ;;  %s1100_s21 = sadd.s32 4294967294, %s1513_s19   ;;  %s1513_s19 = sphi %s1560_s19, %s26_s19   ;;  %s1509_s18 = sphi %s1558_s18, %s2982_s18   ;;  %s1505_s17 = sphi %s1556_s17, %s2981_s17   ;;  %s1501_s16 = sphi %s1554_s16, %s2765_s16   ;;  %s1497_s15 = sphi %s1552_s15, %s2980_s15   ;;  %s1493_s14 = sphi %s1550_s14, %s2979_s14   ;;  %s1489_s13 = sphi %s1548_s13, %s2978_s13   ;;  %s1485_s12 = sphi %s1546_s12, %s2977_s12  }
   0xc   : > { %s38_s22 = sadd.s32 1, %s1509_s18  ;;  %p1482_p1 = scmp.ne.s32.totalorder %s1501_s16, 0 }
   0xd   : > { %p40_p0 = scmp.ge.s32.totalorder %s38_s22, 2  ;;  %p59_p2 = scmp.eq.s32.totalorder %s1513_s19, 0 }
   0xe   : > { %p64_p3 = scmp.ne.s32.totalorder %s1501_s16, %s1497_s15  ;;  %p65_p5 = scmp.eq.s32.totalorder %s1099_s20, 0 }
   0xf   : > { %s2984_s22 = smov (%p40_p0, %s38_s22), 0  ;;  %p1592_p4 = por %p1482_p1, %p59_p2 }
  0x10   : > { %p1596_p6 = por %p65_p5, %p64_p3  ;;  %s106_s25 = ssub.s32 %s1509_s18, %s2984_s22 }
  0x11   : > { %p107_p7 = scmp.eq.s32.totalorder %s106_s25, 0  ;;  %s109_s26 = sadd.s32 1, %s1493_s14 }
  0x12   : > { %p119_p8 = scmp.ne.s32.totalorder %s1493_s14, %s1489_s13  ;;  %p120_p9 = scmp.eq.s32.totalorder %s1099_s20, 1 }
  0x13   : > { %s1604_s27 = scalar_select %p107_p7, %s1493_s14, %s109_s26  }
  0x14   : > { %p125_p10 = scmp.ne.s32.totalorder %s1489_s13, %s1485_s12  ;;  %p126_p11 = scmp.eq.s32.totalorder %s1100_s21, 1 }
  0x15   : > { %p1610_p12 = por %p120_p9, %p119_p8  ;;  %p2811_p0 = scmp.ge.s32.totalorder %s1513_s19, 2 }
  0x16   : > { %p1614_p13 = por %p126_p11, %p125_p10 }
  0x17   : > { %168 = sbr.rel (%p2811_p0) target bundleno = 74 (0x4a), region = 16 }
  0x1c   : > { %171 = sbr.rel (!%p1592_p4) target bundleno = 51 (0x33), region = 20 }
  0x21   : > { %185 = vsyncadd [#allocation5], 1984  ;;  %s1515_s30 = smov [#allocation4]   ;;  %s1322_s7 = scalar_lea.hbm %s2775_s0, 64 }
  0x22   : > { %s190_s4 = sshll.u32 %s1515_s30, 4  ;;  %p1323_p1 = scmp.ne.s32.totalorder %s2775_s0, %s1322_s7  ;;  %s191_s4 = int_to_ptr.vmem [resolvable:$true] %s190_s4 }
  0x23   : > { %p1328_p2 = scmp.lt.s32.totalorder %s1322_s7, %s1322_s7 }
  0x25   : > { %p1330_p3 = pnand %p1328_p2, %p1323_p1 }
  0x27   : > { %1333 = shalt.err (!%p1330_p3)
}
  0x28   : > { %s1334_s10 = scalar_lea.vmem %s191_s4, 64  ;;  %s1340_s11 = scalar_lea.vmem %s191_s4, 4096 }
  0x29   : > { %p1335_p5 = scmp.ne.s32.totalorder %s191_s4, %s1334_s10  ;;  %p1341_p7 = scmp.lt.s32.totalorder %s191_s4, %s191_s4 }
  0x2a   : > { %p1342_p8 = scmp.lt.s32.totalorder %s1340_s11, %s1334_s10 }
  0x2c   : > { %p1343_p9 = por %p1342_p8, %p1341_p7 }
  0x2e   : > { %p1344_p10 = pnand %p1343_p9, %p1335_p5 }
  0x30   : > { %1347 = shalt.err (!%p1344_p10)
}
  0x31   : > { %s1516_s15 = smov 64   ;;  %s1517_s20 = smov 4  }
  0x32   : > { %196 = dma.hbm_to_vmem [thread:$0]  %s2775_s0, 64, %s191_s4, [#allocation5], %s1516_s15, %s1516_s15, %s1517_s20  }
  0x33 PF: > { %199 = sbr.rel (!%p1592_p4) target bundleno = 74 (0x4a), region = 24 }
  0x38   : > { %213 = vsyncadd [#allocation8], 1984  ;;  %s1518_s26 = smov [#allocation7]   ;;  %s1348_s7 = scalar_lea.hbm %s2776_s1, 64 }
  0x39   : > { %s218_s30 = sshll.u32 %s1518_s26, 4  ;;  %p1349_p11 = scmp.ne.s32.totalorder %s2776_s1, %s1348_s7  ;;  %s219_s30 = int_to_ptr.vmem [resolvable:$true] %s218_s30 }
  0x3a   : > { %p1354_p1 = scmp.lt.s32.totalorder %s1348_s7, %s1348_s7 }
  0x3c   : > { %p1356_p2 = pnand %p1354_p1, %p1349_p11 }
  0x3e   : > { %1359 = shalt.err (!%p1356_p2)
}
  0x3f   : > { %s1360_s4 = scalar_lea.vmem %s219_s30, 64  ;;  %s1366_s10 = scalar_lea.vmem %s219_s30, 4096 }
  0x40   : > { %p1361_p3 = scmp.ne.s32.totalorder %s219_s30, %s1360_s4  ;;  %p1367_p5 = scmp.lt.s32.totalorder %s219_s30, %s219_s30 }
  0x41   : > { %p1368_p4 = scmp.lt.s32.totalorder %s1366_s10, %s1360_s4 }
  0x43   : > { %p1369_p7 = por %p1368_p4, %p1367_p5 }
  0x45   : > { %p1370_p8 = pnand %p1369_p7, %p1361_p3 }
  0x47   : > { %1373 = shalt.err (!%p1370_p8)
}
  0x48   : > { %s1519_s23 = smov 64   ;;  %s1520_s11 = smov 4  }
  0x49   : > { %224 = dma.hbm_to_vmem [thread:$0]  %s2776_s1, 64, %s219_s30, [#allocation8], %s1519_s23, %s1519_s23, %s1520_s11  }
  0x4a PF: > { %p1117_p9 = scmp.ge.s32.totalorder %s1513_s19, 1  ;;  %p226_p10 = scmp.lt.s32.totalorder %s1513_s19, 3 }
  0x4c   : > { %p227_p11 = pnand %p1117_p9, %p226_p10 }
  0x4d   : > { %s232_s21 = sand.u32 (!%p227_p11), 1, %s1501_s16  }
  0x4e   : > { %230 = sbr.rel (%p227_p11) target bundleno = 299 (0x12b), region = 28  ;;  %s1118_s25 = sshll.u32 (!%p227_p11), %s232_s21, 7 }
  0x4f   : > { %s233_s26 = scalar_lea.sflag (!%p227_p11), [#allocation5], %s232_s21  ;;  %s1646_s5 = scalar_lea.vmem (!%p227_p11), [#allocation4], %s1118_s25 }
  0x53   : > { %1463 = dma.done.wait (%p1596_p6), %s233_s26, 2048  }
  0x54   : > { %1465 = vsyncadd (%p1596_p6), %s233_s26, 4294965248  ;;  %s242_s30 = scalar_lea.sflag [#allocation8], %s232_s21  ;;  %s1652_s6 = scalar_lea.vmem [#allocation7], %s1118_s25 }
  0x55   : > { %1467 = dma.done.wait (%p1596_p6), %s242_s30, 2048  }
  0x56   : > { %1469 = vsyncadd (%p1596_p6), %s242_s30, 4294965248  ;;  %s1659_s7 = sand.u32 1, %s1489_s13   ;;  %v1521_v0 = vmov 0.0   ;;  %p1122_p1 = scmp.ne.s32.totalorder %s1505_s17, 0 }
  0x57   : > { %s1120_s8 = sshll.u32 %s1659_s7, 3  ;;  %295 = vst [vmem:[#allocation2] sm:$0xff] %v1521_v0  ;;  %296 = vst [vmem:[#allocation3] sm:$0xff] %v1521_v0 }
  0x58   : > { %s1662_s9 = scalar_lea.vmem [#allocation9], %s1120_s8  ;;  %s1664_s4 = scalar_lea.vmem [#allocation10], %s1120_s8 }
  0x59   : > { %300 = sbr.rel (%p1122_p1) target bundleno = 182 (0xb6), region = 44 }
  0x5e   : > { %v367_v1 = vlaneseq  ;;  %s1123_s24 = sshll.u32 %s1505_s17, 7  ;;  %v1681_v11 = vld [vmem:[%s1646_s5] sm:$0xff]  ;;  %v1686_v14 = vld [vmem:[%s1646_s5 + $0x8] sm:$0xff]  ;;  %v1689_v15 = vld [vmem:[%s1646_s5 + $0x10] sm:$0xff] }
  0x5f   : > { %v1671_v4 = vstv %s1123_s24  ;;  %v1692_v16 = vld [vmem:[%s1646_s5 + $0x18] sm:$0xff]  ;;  %v1697_v20 = vld [vmem:[%s1646_s5 + $0x20] sm:$0xff]  ;;  %v517_v25 = vsub.f32 1.0, %v1681_v11  ;;  %v518_v27 = vsub.f32 1.0, %v1686_v14  ;;  %v519_v28 = vsub.f32 1.0, %v1689_v15  ;;  %v1712_v30 = vld [vmem:[%s1652_s6 + $0x8] sm:$0xff] }
  0x60   : > { %v1667_v2 = vshrl.u32 %v367_v1, 7  ;;  %v1683_v12 = vand.u32 127, %v367_v1  ;;  %v1700_v21 = vld [vmem:[%s1652_s6] sm:$0xff]  ;;  %v520_v29 = vsub.f32 1.0, %v1692_v16  ;;  %v1715_v31 = vld [vmem:[%s1652_s6 + $0x10] sm:$0xff]  ;;  %v521_v38 = vsub.f32 1.0, %v1697_v20 }
  0x61   : > { %vm335_vm0 = vcmp.ge.f32.partialorder %v1700_v21, 0.6  ;;  %v1727_v39 = vld [vmem:[%s1652_s6 + $0x18] sm:$0xff]  ;;  %vm336_vm1 = vcmp.ge.f32.partialorder %v1712_v30, 0.6  ;;  %v1739_v45 = vld [vmem:[%s1652_s6 + $0x20] sm:$0xff] }
  0x62   : > { %v369_v3 = vadd.s32 8, %v1667_v2  ;;  %v370_v5 = vadd.s32 16, %v1667_v2  ;;  %v388_v6 = vadd.s32 %v1671_v4, %v1667_v2  ;;  %v371_v7 = vadd.s32 24, %v1667_v2  ;;  %v1742_v46 = vld [vmem:[%s1652_s6 + $0x28] sm:$0xff]  ;;  %v1750_v50 = vld [vmem:[%s1652_s6 + $0x30] sm:$0xff]  ;;  %v1757_v54 = vld [vmem:[%s1652_s6 + $0x38] sm:$0xff] }
  0x63   : > { %v372_v9 = vadd.s32 32, %v1667_v2  ;;  %v373_v17 = vadd.s32 40, %v1667_v2  ;;  %v374_v22 = vadd.s32 48, %v1667_v2  ;;  %v375_v32 = vadd.s32 56, %v1667_v2 }
  0x64   : > { %v389_v8 = vadd.s32 %v1671_v4, %v369_v3  ;;  %v390_v10 = vadd.s32 %v1671_v4, %v370_v5  ;;  %v421_v13 = vmul.u32 128, %v388_v6  ;;  %v391_v18 = vadd.s32 %v1671_v4, %v371_v7  ;;  %v308_v6 = vld [vmem:[%s1646_s5 + $0x28] sm:$0xff] }
  0x65   : > { %v392_v23 = vadd.s32 %v1671_v4, %v372_v9  ;;  %v393_v33 = vadd.s32 %v1671_v4, %v373_v17  ;;  %v376_v36 = vadd.s32 64, %v1667_v2  ;;  %v377_v37 = vadd.s32 72, %v1667_v2 }
  0x66   : > { %v422_v19 = vmul.u32 128, %v389_v8  ;;  %v423_v24 = vmul.u32 128, %v390_v10  ;;  %v1706_v26 = vadd.s32 %v421_v13, %v1683_v12  ;;  %v378_v40 = vadd.s32 80, %v1667_v2 }
  0x67   : > { %v424_v34 = vmul.u32 128, %v391_v18  ;;  %v394_v41 = vadd.s32 %v1671_v4, %v374_v22  ;;  %v425_v42 = vmul.u32 128, %v392_v23  ;;  %vm337_vm2 = vcmp.ge.f32.partialorder %v1715_v31, 0.6  ;;  %v309_v18 = vld [vmem:[%s1646_s5 + $0x30] sm:$0xff] }
  0x68   : > { %v1720_v35 = vadd.s32 %v422_v19, %v1683_v12  ;;  %v1732_v43 = vadd.s32 %v423_v24, %v1683_v12  ;;  %v379_v44 = vadd.s32 88, %v1667_v2  ;;  %vm2786_vm3 = vcmp.lt.s32.totalorder %v1706_v26, 300  ;;  %v1824_v19 = vld [vmem:[%s1652_s6 + $0x40] sm:$0xff] }
  0x69   : > { %v395_v47 = vadd.s32 %v1671_v4, %v375_v32  ;;  %v426_v48 = vmul.u32 128, %v393_v33  ;;  %v1746_v49 = vadd.s32 %v424_v34, %v1683_v12  ;;  %vm338_vm5 = vcmp.ge.f32.partialorder %v1727_v39, 0.6  ;;  %vm1768_vm7 = vmand %vm335_vm0, %vm2786_vm3 }
  0x6a   : > { %vm2784_vm4 = vcmp.lt.s32.totalorder %v1720_v35, 300  ;;  %v380_v51 = vadd.s32 96, %v1667_v2  ;;  %v381_v52 = vadd.s32 104, %v1667_v2  ;;  %v396_v53 = vadd.s32 %v1671_v4, %v376_v36 }
  0x6b   : > { %v397_v55 = vadd.s32 %v1671_v4, %v377_v37  ;;  %v427_v56 = vmul.u32 128, %v394_v41  ;;  %v1761_v57 = vadd.s32 %v425_v42, %v1683_v12  ;;  %vm2783_vm6 = vcmp.lt.s32.totalorder %v1732_v43, 300  ;;  %vm1780_vm10 = vmand %vm336_vm1, %vm2784_vm4  ;;  %v1864_v37 = vld [vmem:[%s1652_s6 + $0x48] sm:$0xff]  ;;  %v311_v42 = vld [vmem:[%s1646_s5 + $0x40] sm:$0xff] }
  0x6c   : > { %vm339_vm8 = vcmp.ge.f32.partialorder %v1739_v45, 0.6  ;;  %vm340_vm9 = vcmp.ge.f32.partialorder %v1742_v46, 0.6  ;;  %v382_v59 = vadd.s32 112, %v1667_v2  ;;  %v398_v60 = vadd.s32 %v1671_v4, %v378_v40  ;;  %vm1796_vm14 = vmand %vm337_vm2, %vm2783_vm6  ;;  %v1867_v40 = vld [vmem:[%s1652_s6 + $0x50] sm:$0xff] }
  0x6d   : > { %vm341_vm11 = vcmp.ge.f32.partialorder %v1750_v50, 0.6  ;;  %v428_v62 = vmul.u32 128, %v395_v47  ;;  %v1786_v63 = vadd.s32 %v426_v48, %v1683_v12  ;;  %vm2780_vm12 = vcmp.lt.s32.totalorder %v1746_v49, 300 }
  0x6e   : > { %vm342_vm13 = vcmp.ge.f32.partialorder %v1757_v54, 0.6  ;;  %v383_v0 = vadd.s32 120, %v1667_v2  ;;  %v399_v1 = vadd.s32 %v1671_v4, %v379_v44  ;;  %v533_v5 = vsel %vm1768_vm7, %v1681_v11, %v517_v25  ;;  %vm1818_vm0 = vmand %vm338_vm5, %vm2780_vm12 }
  0x6f   : > { %v429_v7 = vmul.u32 128, %v396_v53  ;;  %v1805_v8 = vadd.s32 %v427_v56, %v1683_v12  ;;  %vm2779_vm15 = vcmp.lt.s32.totalorder %v1761_v57, 300  ;;  %v534_v2 = vsel %vm1780_vm10, %v1686_v14, %v518_v27 }
  0x70   : > { %v400_v9 = vadd.s32 %v1671_v4, %v380_v51  ;;  %v401_v10 = vadd.s32 %v1671_v4, %v381_v52  ;;  %v402_v13 = vadd.s32 %v1671_v4, %v382_v59  ;;  %v430_v17 = vmul.u32 128, %v397_v55  ;;  %vm1840_vm2 = vmand %vm339_vm8, %vm2779_vm15  ;;  %v1891_v52 = vld [vmem:[%s1652_s6 + $0x58] sm:$0xff]  ;;  %v312_v55 = vld [vmem:[%s1646_s5 + $0x48] sm:$0xff] }
  0x71   : > { %v2822_v11 = vmov 0  ;;  %v1827_v14 = vadd.s32 %v428_v62, %v1683_v12  ;;  %vm2781_vm1 = vcmp.lt.s32.totalorder %v1786_v63, 300  ;;  %v535_v22 = vsel %vm1796_vm14, %v1689_v15, %v519_v28  ;;  %v310_v28 = vld [vmem:[%s1646_s5 + $0x38] sm:$0xff] }
  0x72   : > { %v2823_v11 = vsel %vm1818_vm0, 4294967295, %v2822_v11  ;;  %1258 = vlog2.f32 %v533_v5  ;;  %v403_v23 = vadd.s32 %v1671_v4, %v383_v0  ;;  %v431_v24 = vmul.u32 128, %v398_v60  ;;  %vm1859_vm15 = vmand %vm340_vm9, %vm2781_vm1  ;;  %v1914_v60 = vld [vmem:[%s1652_s6 + $0x60] sm:$0xff]  ;;  %v313_v5 = vld [vmem:[%s1646_s5 + $0x50] sm:$0xff] }
  0x73   : > { %v2824_v25 = vmov 0  ;;  %v522_v27 = vsub.f32 1.0, %v308_v6  ;;  %1260 = vlog2.f32 %v534_v2  ;;  %v432_v32 = vmul.u32 128, %v399_v1 }
  0x74   : > { %v2825_v25 = vsel %vm1840_vm2, 4294967295, %v2824_v25  ;;  %v1845_v15 = vadd.s32 %v429_v7, %v1683_v12  ;;  %vm2782_vm5 = vcmp.lt.s32.totalorder %v1805_v8, 300  ;;  %v536_v4 = vsel %vm1818_vm0, %v1692_v16, %v520_v29 }
  0x75   : > { %vm343_vm8 = vcmp.ge.f32.partialorder %v1824_v19, 0.6  ;;  %v433_v33 = vmul.u32 128, %v400_v9  ;;  %v2826_v34 = vmov 0  ;;  %v523_v36 = vsub.f32 1.0, %v309_v18  ;;  %vm1886_vm9 = vmand %vm341_vm11, %vm2782_vm5  ;;  %v1940_v9 = vld [vmem:[%s1652_s6 + $0x70] sm:$0xff] }
  0x76   : > { %v2827_v34 = vsel %vm1859_vm15, 4294967295, %v2826_v34  ;;  %1262 = vlog2.f32 %v535_v22  ;;  %v434_v16 = vmul.u32 128, %v401_v10  ;;  %v1870_v29 = vadd.s32 %v430_v17, %v1683_v12  ;;  %v1950_v22 = vld [vmem:[%s1652_s6 + $0x78] sm:$0xff] }
  0x77   : > { %vm2785_vm12 = vcmp.lt.s32.totalorder %v1827_v14, 300  ;;  %v537_v41 = vsel %vm1840_vm2, %v1697_v20, %v521_v38  ;;  %v435_v44 = vmul.u32 128, %v402_v13  ;;  %v436_v47 = vmul.u32 128, %v403_v23 }
  0x78   : > { %v1880_v48 = vadd.s32 %v431_v24, %v1683_v12  ;;  %v2828_v51 = vmov 0  ;;  %1264 = vlog2.f32 %v536_v4  ;;  %v1894_v20 = vadd.s32 %v432_v32, %v1683_v12  ;;  %vm1909_vm6 = vmand %vm342_vm13, %vm2785_vm12  ;;  %v315_v4 = vld [vmem:[%s1646_s5 + $0x60] sm:$0xff] }
  0x79   : > { %v2829_v51 = vsel %vm1886_vm9, 4294967295, %v2828_v51  ;;  %vm2787_vm1 = vcmp.lt.s32.totalorder %v1845_v15, 300  ;;  %v524_v38 = vsub.f32 1.0, %v310_v28  ;;  %v538_v53 = vsel %vm1859_vm15, %v308_v6, %v522_v27  ;;  %v1924_v6 = vld [vmem:[%s1652_s6 + $0x68] sm:$0xff] }
  0x7a   : > { %vm344_vm11 = vcmp.ge.f32.partialorder %v1864_v37, 0.6  ;;  %v1903_v56 = vadd.s32 %v433_v33, %v1683_v12  ;;  %v2830_v59 = vmov 0  ;;  %1266 = vlog2.f32 %v537_v41  ;;  %vm1935_vm3 = vmand %vm343_vm8, %vm2787_vm1 }
  0x7b   : > { %v2831_v59 = vsel %vm1909_vm6, 4294967295, %v2830_v59  ;;  %v1917_v62 = vadd.s32 %v434_v16, %v1683_v12  ;;  %vm2792_vm4 = vcmp.lt.s32.totalorder %v1870_v29, 300  ;;  %v525_v0 = vsub.f32 1.0, %v311_v42 }
  0x7c   : > { %v539_v1 = vsel %vm1886_vm9, %v309_v18, %v523_v36  ;;  %v1928_v7 = vadd.s32 %v435_v44, %v1683_v12  ;;  %v2833_v2 = vmov 0  ;;  %1268 = vlog2.f32 %v538_v53  ;;  %v314_v18 = vld [vmem:[%s1646_s5 + $0x58] sm:$0xff]  ;;  %vm1958_vm5 = vmand %vm344_vm11, %vm2792_vm4 }
  0x7d   : > { %v2834_v2 = vsel %vm1935_vm3, 4294967295, %v2833_v2  ;;  %v1943_v10 = vadd.s32 %v436_v47, %v1683_v12  ;;  %v526_v13 = vsub.f32 1.0, %v312_v55  ;;  %v540_v17 = vsel %vm1909_vm6, %v310_v28, %v524_v38  ;;  %v316_v28 = vld [vmem:[%s1646_s5 + $0x68] sm:$0xff]  ;;  %v317_v38 = vld [vmem:[%s1646_s5 + $0x70] sm:$0xff]  ;;  %v318_v53 = vld [vmem:[%s1646_s5 + $0x78] sm:$0xff] }
  0x7e   : > { %2832 = vst [vmem:[#allocation16_spill] sm:$0xff] %v1928_v7  ;;  %v2835_v12 = vmov 0  ;;  %1270 = vlog2.f32 %v539_v1  ;;  %vm2837_vm6 = vcmp.lt.s32.totalorder %v1880_v48, 300  ;;  %vm2838_vm9 = vcmp.ge.f32.partialorder %v1867_v40, 0.6 }
  0x7f   : > { %v2836_v12 = vsel %vm1958_vm5, 4294967295, %v2835_v12  ;;  %vm1968_vm8 = vmand %vm2838_vm9, %vm2837_vm6  ;;  %v2839_v23 = vmov 0  ;;  %v527_v24 = vsub.f32 1.0, %v313_v5  ;;  %v541_v27 = vsel %vm1935_vm3, %v311_v42, %v525_v0  ;;  %v1259_v32 = vpop.eup %1258 }
  0x80   : > { %v2840_v23 = vsel %vm1968_vm8, 4294967295, %v2839_v23  ;;  %vm2841_vm13 = vcmp.lt.s32.totalorder %v1894_v20, 300  ;;  %vm2842_vm6 = vcmp.ge.f32.partialorder %v1891_v52, 0.6  ;;  %1272 = vlog2.f32 %v540_v17  ;;  %v1261_v36 = vpop.eup %1260 }
  0x81   : > { %vm1982_vm9 = vmand %vm2842_vm6, %vm2841_vm13  ;;  %vm2845_vm3 = vcmp.lt.s32.totalorder %v1903_v56, 300  ;;  %vm2846_vm11 = vcmp.ge.f32.partialorder %v1914_v60, 0.6  ;;  %v528_v41 = vsub.f32 1.0, %v314_v18  ;;  %v542_v42 = vsel %vm1958_vm5, %v312_v55, %v526_v13 }
  0x82   : > { %vm1992_vm15 = vmand %vm2846_vm11, %vm2845_vm3  ;;  %vm2849_vm6 = vcmp.lt.s32.totalorder %v1917_v62, 300  ;;  %vm2850_vm12 = vcmp.ge.f32.partialorder %v1924_v6, 0.6  ;;  %v2851_v44 = vmov 0  ;;  %1274 = vlog2.f32 %v541_v27 }
  0x83   : > { %vm2003_vm4 = vmand %vm2850_vm12, %vm2849_vm6  ;;  %v1263_v47 = vpop.eup %1262  ;;  %vm352_vm3 = vcmp.le.f32.partialorder %v1712_v30, 0.45  ;;  %vm2853_vm11 = vcmp.lt.s32.totalorder %v1928_v7, 300  ;;  %vm2854_vm1 = vcmp.ge.f32.partialorder %v1940_v9, 0.6  ;;  %v2855_v55 = vmov 0 }
  0x84   : > { %v2852_v44 = vsel %vm2003_vm4, 4294967295, %v2851_v44  ;;  %vm2014_vm5 = vmand %vm2854_vm1, %vm2853_vm11  ;;  %v529_v0 = vsub.f32 1.0, %v315_v4  ;;  %v530_v1 = vsub.f32 1.0, %v316_v28  ;;  %v543_v13 = vsel %vm1968_vm8, %v313_v5, %v527_v24 }
  0x85   : > { %v2856_v55 = vsel %vm2014_vm5, 4294967295, %v2855_v55  ;;  %vm353_vm12 = vcmp.le.f32.partialorder %v1715_v31, 0.45  ;;  %vm2857_vm6 = vcmp.lt.s32.totalorder %v1943_v10, 300  ;;  %vm2858_vm13 = vcmp.ge.f32.partialorder %v1950_v22, 0.6  ;;  %v1265_v7 = vpop.eup %1264 }
  0x86   : > { %vm2025_vm2 = vmand %vm2858_vm13, %vm2857_vm6  ;;  %v2859_v30 = vmov 0  ;;  %v582_v17 = vmul.f32 0.6931472, %v1259_v32  ;;  %v584_v27 = vmul.f32 0.6931472, %v1261_v36  ;;  %1276 = vlog2.f32 %v542_v42 }
  0x87   : > { %v2860_v30 = vsel %vm2025_vm2, 4294967295, %v2859_v30  ;;  %vm354_vm1 = vcmp.le.f32.partialorder %v1727_v39, 0.45  ;;  %vm2861_vm11 = vcmp.lt.s32.totalorder %v1706_v26, 300  ;;  %vm2862_vm8 = vcmp.le.f32.partialorder %v1700_v21, 0.45  ;;  %v1267_v39 = vpop.eup %1266 }
  0x88   : > { %vm2034_vm0 = vmand %vm2862_vm8, %vm2861_vm11  ;;  %v544_v5 = vsel %vm1982_vm9, %v314_v18, %v528_v41  ;;  %vm2865_vm13 = vcmp.lt.s32.totalorder %v1720_v35, 300  ;;  %v586_v32 = vmul.f32 0.6931472, %v1263_v47  ;;  %1278 = vlog2.f32 %v543_v13 }
  0x89   : > { %vm2042_vm6 = vmand %vm352_vm3, %vm2865_vm13  ;;  %vm2868_vm2 = vcmp.lt.s32.totalorder %v1732_v43, 300  ;;  %v531_v26 = vsub.f32 1.0, %v317_v38  ;;  %v532_v36 = vsub.f32 1.0, %v318_v53  ;;  %v545_v18 = vsel %vm1992_vm15, %v315_v4, %v529_v0  ;;  %v1269_v13 = vpop.eup %1268 }
  0x8a   : > { %vm2048_vm5 = vmand %vm353_vm12, %vm2868_vm2  ;;  %v546_v35 = vsel %vm2003_vm4, %v316_v28, %v530_v1  ;;  %vm2871_vm8 = vcmp.lt.s32.totalorder %v1746_v49, 300  ;;  %v588_v42 = vmul.f32 0.6931472, %v1265_v7  ;;  %1280 = vlog2.f32 %v544_v5 }
  0x8b   : > { %vm2058_vm3 = vmand %vm354_vm1, %vm2871_vm8  ;;  %v613_v43 = vmax.f32 %v582_v17, -100.0  ;;  %v614_v47 = vmax.f32 %v584_v27, -100.0  ;;  %vm355_vm2 = vcmp.le.f32.partialorder %v1739_v45, 0.45  ;;  %v590_v49 = vmul.f32 0.6931472, %v1267_v39  ;;  %v1271_v7 = vpop.eup %1270 }
  0x8c   : > { %1282 = vlog2.f32 %v545_v18  ;;  %v615_v4 = vmax.f32 %v586_v32, -100.0  ;;  %vm2874_vm8 = vnez %v2856_v55  ;;  %vm2875_vm12 = vnez %v2860_v30  ;;  %vm2879_vm13 = vmor %vm1768_vm7, %vm2034_vm0 }
  0x8d   : > { %v547_v45 = vsel %vm2874_vm8, %v317_v38, %v531_v26  ;;  %v548_v28 = vsel %vm2875_vm12, %v318_v53, %v532_v36  ;;  %1284 = vlog2.f32 %v546_v35  ;;  %vm2876_vm1 = vcmp.lt.s32.totalorder %v1761_v57, 300  ;;  %vm2880_vm11 = vmor %vm1780_vm10, %vm2042_vm6  ;;  %v1273_v53 = vpop.eup %1272 }
  0x8e   : > { %vm2082_vm4 = vmand %vm355_vm2, %vm2876_vm1  ;;  %v592_v1 = vmul.f32 0.6931472, %v1269_v13  ;;  %v616_v17 = vmax.f32 %v588_v42, -100.0  ;;  %v629_v27 = vsel %vm2879_vm13, %v613_v43, 0.0  ;;  %v630_v38 = vsel %vm2880_vm11, %v614_v47, 0.0  ;;  %v2922_v42 = vld [vmem:[#allocation16_spill] sm:$0xff] }
  0x8f   : > { %vm2881_vm1 = vnez %v2823_v11  ;;  %v1522_v57 = vmov 0.0   ;;  %vm2882_vm2 = vcmp.lt.s32.totalorder %v1786_v63, 300  ;;  %vm2883_vm8 = vcmp.le.f32.partialorder %v1742_v46, 0.45  ;;  %vm2886_vm7 = vmor %vm1796_vm14, %vm2048_vm5  ;;  %v1275_v24 = vpop.eup %1274 }
  0x90   : > { %v1124_v5 = vsel %vm2879_vm13, 1.0, %v1522_v57  ;;  %v1125_v32 = vsel %vm2880_vm11, 1.0, %v1522_v57  ;;  %vm2117_vm12 = vmand %vm2883_vm8, %vm2882_vm2  ;;  %v594_v58 = vmul.f32 0.6931472, %v1271_v7  ;;  %1286 = vlog2.f32 %v547_v45 }
  0x91   : > { %v617_v31 = vmax.f32 %v590_v49, -100.0  ;;  %v631_v61 = vsel %vm2886_vm7, %v615_v4, 0.0  ;;  %vm358_vm10 = vcmp.le.f32.partialorder %v1757_v54, 0.45  ;;  %vm2887_vm0 = vnez %v2825_v25  ;;  %vm2888_vm8 = vmmov %vm2886_vm7 }
  0x92   : > { %vm505_vm6 = vmor %vm2887_vm0, %vm2082_vm4  ;;  %v1126_v46 = vsel %vm2888_vm8, 1.0, %v1522_v57  ;;  %1288 = vlog2.f32 %v548_v28  ;;  %v645_v63 = vadd.f32 %v630_v38, %v629_v27  ;;  %vm2889_vm2 = vcmp.lt.s32.totalorder %v1805_v8, 300 }
  0x93   : > { %vm2890_vm13 = vcmp.le.f32.partialorder %v1750_v50, 0.45  ;;  %v596_v36 = vmul.f32 0.6931472, %v1273_v53  ;;  %v618_v18 = vmax.f32 %v592_v1, -100.0  ;;  %vm2893_vm7 = vmor %vm2881_vm1, %vm2058_vm3  ;;  %v661_v21 = vadd.f32 %v1125_v32, %v1124_v5  ;;  %v1277_v35 = vpop.eup %1276 }
  0x94   : > { %vm2141_vm11 = vmand %vm2890_vm13, %vm2889_vm2  ;;  %v632_v3 = vsel %vm2893_vm7, %v616_v17, 0.0  ;;  %vm359_vm14 = vcmp.le.f32.partialorder %v1824_v19, 0.45  ;;  %vm2894_vm5 = vnez %v2827_v34  ;;  %v646_v8 = vadd.f32 %v645_v63, %v631_v61 }
  0x95   : > { %vm506_vm8 = vmor %vm2894_vm5, %vm2117_vm12  ;;  %vm2896_vm13 = vcmp.lt.s32.totalorder %v1827_v14, 300  ;;  %v598_v19 = vmul.f32 0.6931472, %v1275_v24  ;;  %v619_v43 = vmax.f32 %v594_v58, -100.0  ;;  %v633_v11 = vsel %vm505_vm6, %v617_v31, 0.0  ;;  %v1279_v47 = vpop.eup %1278 }
  0x96   : > { %vm2895_vm2 = vmmov %vm2893_vm7  ;;  %v662_v41 = vadd.f32 %v1126_v46, %v661_v21  ;;  %vm360_vm3 = vcmp.le.f32.partialorder %v1864_v37, 0.45  ;;  %vm2899_vm1 = vnez %v2829_v51  ;;  %v1128_v54 = vsel %vm505_vm6, 1.0, %v1522_v57 }
  0x97   : > { %v1127_v50 = vsel %vm2895_vm2, 1.0, %v1522_v57  ;;  %vm2165_vm7 = vmand %vm358_vm10, %vm2896_vm13  ;;  %v647_v14 = vadd.f32 %v646_v8, %v632_v3  ;;  %vm2900_vm2 = vcmp.lt.s32.totalorder %v1845_v15, 300  ;;  %v600_v37 = vmul.f32 0.6931472, %v1277_v35  ;;  %v1281_v7 = vpop.eup %1280 }
  0x98   : > { %vm507_vm10 = vmor %vm2899_vm1, %vm2141_vm11  ;;  %v620_v49 = vmax.f32 %v596_v36, -100.0  ;;  %v634_v4 = vsel %vm506_vm8, %v618_v18, 0.0  ;;  %v663_v25 = vadd.f32 %v1127_v50, %v662_v41  ;;  %vm361_vm4 = vcmp.le.f32.partialorder %v1867_v40, 0.45 }
  0x99   : > { %vm2187_vm13 = vmand %vm359_vm14, %vm2900_vm2  ;;  %vm2903_vm0 = vnez %v2831_v59  ;;  %v1129_v15 = vsel %vm506_vm8, 1.0, %v1522_v57  ;;  %v648_v45 = vadd.f32 %v647_v14, %v633_v11  ;;  %vm2904_vm14 = vcmp.lt.s32.totalorder %v1870_v29, 300  ;;  %v1283_v27 = vpop.eup %1282 }
  0x9a   : > { %vm508_vm6 = vmor %vm2903_vm0, %vm2165_vm7  ;;  %v602_v0 = vmul.f32 0.6931472, %v1279_v47  ;;  %v621_v1 = vmax.f32 %v598_v19, -100.0  ;;  %v635_v17 = vsel %vm507_vm10, %v619_v43, 0.0  ;;  %v664_v34 = vadd.f32 %v1128_v54, %v663_v25  ;;  %v1285_v53 = vpop.eup %1284 }
  0x9b   : > { %vm2209_vm2 = vmand %vm360_vm3, %vm2904_vm14  ;;  %vm362_vm12 = vcmp.le.f32.partialorder %v1891_v52, 0.45  ;;  %vm2907_vm5 = vnez %v2834_v2  ;;  %v1130_v29 = vsel %vm507_vm10, 1.0, %v1522_v57  ;;  %v649_v38 = vadd.f32 %v648_v45, %v634_v4 }
  0x9c   : > { %vm509_vm8 = vmor %vm2907_vm5, %vm2187_vm13  ;;  %vm2908_vm3 = vcmp.lt.s32.totalorder %v1880_v48, 300  ;;  %v604_v5 = vmul.f32 0.6931472, %v1281_v7  ;;  %v622_v32 = vmax.f32 %v600_v37, -100.0  ;;  %v636_v51 = vsel %vm508_vm6, %v620_v49, 0.0 }
  0x9d   : > { %vm2233_vm14 = vmand %vm361_vm4, %vm2908_vm3  ;;  %v665_v39 = vadd.f32 %v1129_v15, %v664_v34  ;;  %vm363_vm11 = vcmp.le.f32.partialorder %v1914_v60, 0.45  ;;  %vm2911_vm1 = vnez %v2836_v12  ;;  %v1131_v40 = vsel %vm508_vm6, 1.0, %v1522_v57  ;;  %v1287_v46 = vpop.eup %1286  ;;  %v301_v34 = vld [vmem:[#allocation2] sm:$0xff] }
  0x9e   : > { %vm510_vm10 = vmor %vm2911_vm1, %vm2209_vm2  ;;  %v650_v48 = vadd.f32 %v649_v38, %v635_v17  ;;  %vm2912_vm4 = vcmp.lt.s32.totalorder %v1894_v20, 300  ;;  %v606_v31 = vmul.f32 0.6931472, %v1283_v27  ;;  %v623_v61 = vmax.f32 %v602_v0, -100.0 }
  0x9f   : > { %vm2255_vm3 = vmand %vm362_vm12, %vm2912_vm4  ;;  %v637_v24 = vsel %vm509_vm8, %v621_v1, 0.0  ;;  %v666_v59 = vadd.f32 %v1130_v29, %v665_v39  ;;  %vm364_vm7 = vcmp.le.f32.partialorder %v1924_v6, 0.45  ;;  %vm2915_vm0 = vnez %v2840_v23  ;;  %v1289_v26 = vpop.eup %1288  ;;  %v302_v29 = vld [vmem:[#allocation3] sm:$0xff] }
  0xa0   : > { %vm511_vm6 = vmor %vm2915_vm0, %vm2233_vm14  ;;  %v1132_v20 = vsel %vm509_vm8, 1.0, %v1522_v57  ;;  %v651_v63 = vadd.f32 %v650_v48, %v636_v51  ;;  %vm2916_vm12 = vcmp.lt.s32.totalorder %v1903_v56, 300  ;;  %v608_v36 = vmul.f32 0.6931472, %v1285_v53 }
  0xa1   : > { %vm2279_vm4 = vmand %vm363_vm11, %vm2916_vm12  ;;  %v624_v18 = vmax.f32 %v604_v5, -100.0  ;;  %v638_v2 = vsel %vm510_vm10, %v622_v32, 0.0  ;;  %v667_v3 = vadd.f32 %v1131_v40, %v666_v59  ;;  %vm365_vm13 = vcmp.le.f32.partialorder %v1940_v9, 0.45 }
  0xa2   : > { %vm512_vm5 = vmor %vm1982_vm9, %vm2255_vm3  ;;  %v1133_v56 = vsel %vm510_vm10, 1.0, %v1522_v57  ;;  %v652_v60 = vadd.f32 %v651_v63, %v637_v24  ;;  %vm2919_vm8 = vcmp.lt.s32.totalorder %v1917_v62, 300  ;;  %v610_v9 = vmul.f32 0.6931472, %v1287_v46 }
  0xa3   : > { %vm2301_vm11 = vmand %vm364_vm7, %vm2919_vm8  ;;  %v625_v35 = vmax.f32 %v606_v31, -100.0  ;;  %v639_v50 = vsel %vm511_vm6, %v623_v61, 0.0  ;;  %v668_v12 = vadd.f32 %v1132_v20, %v667_v3  ;;  %vm366_vm12 = vcmp.le.f32.partialorder %v1950_v22, 0.45 }
  0xa4   : > { %vm513_vm2 = vmor %vm1992_vm15, %vm2279_vm4  ;;  %v1134_v62 = vsel %vm511_vm6, 1.0, %v1522_v57  ;;  %v653_v8 = vadd.f32 %v652_v60, %v638_v2  ;;  %vm2923_vm1 = vcmp.lt.s32.totalorder %v2922_v42, 300  ;;  %v612_v22 = vmul.f32 0.6931472, %v1289_v26 }
  0xa5   : > { %vm2323_vm10 = vmand %vm365_vm13, %vm2923_vm1  ;;  %v626_v43 = vmax.f32 %v608_v36, -100.0  ;;  %v640_v11 = vsel %vm512_vm5, %v624_v18, 0.0  ;;  %v669_v23 = vadd.f32 %v1133_v56, %v668_v12  ;;  %vm2926_vm14 = vnez %v2852_v44 }
  0xa6   : > { %vm514_vm7 = vmor %vm2926_vm14, %vm2301_vm11  ;;  %v1135_v41 = vsel %vm512_vm5, 1.0, %v1522_v57  ;;  %v654_v47 = vadd.f32 %v653_v8, %v639_v50  ;;  %vm2927_vm0 = vcmp.lt.s32.totalorder %v1943_v10, 300  ;;  %v627_v14 = vmax.f32 %v610_v9, -100.0 }
  0xa7   : > { %vm2344_vm6 = vmand %vm366_vm12, %vm2927_vm0  ;;  %v641_v44 = vsel %vm513_vm2, %v625_v35, 0.0  ;;  %v670_v13 = vadd.f32 %v1134_v62, %v669_v23  ;;  %vm2930_vm9 = vnez %v2856_v55  ;;  %v1136_v10 = vsel %vm513_vm2, 1.0, %v1522_v57 }
  0xa8   : > { %vm515_vm3 = vmor %vm2930_vm9, %vm2323_vm10  ;;  %v655_v33 = vadd.f32 %v654_v47, %v640_v11  ;;  %v628_v37 = vmax.f32 %v612_v22, -100.0  ;;  %v642_v49 = vsel %vm514_vm7, %v626_v43, 0.0  ;;  %vm2931_vm13 = vnez %v2860_v30 }
  0xa9   : > { %v671_v4 = vadd.f32 %v1135_v41, %v670_v13  ;;  %vm516_vm5 = vmor %vm2931_vm13, %vm2344_vm6  ;;  %v1137_v25 = vsel %vm514_vm7, 1.0, %v1522_v57  ;;  %v643_v7 = vsel %vm515_vm3, %v627_v14, 0.0  ;;  %v1138_v16 = vsel %vm515_vm3, 1.0, %v1522_v57 }
  0xaa   : > { %v656_v55 = vadd.f32 %v655_v33, %v641_v44  ;;  %v644_v28 = vsel %vm516_vm5, %v628_v37, 0.0  ;;  %v1139_v1 = vsel %vm516_vm5, 1.0, %v1522_v57 }
  0xab   : > { %v672_v15 = vadd.f32 %v1136_v10, %v671_v4 }
  0xac   : > { %v657_v45 = vadd.f32 %v656_v55, %v642_v49 }
  0xad   : > { %v673_v0 = vadd.f32 %v1137_v25, %v672_v15 }
  0xae   : > { %v658_v17 = vadd.f32 %v657_v45, %v643_v7 }
  0xaf   : > { %v674_v27 = vadd.f32 %v1138_v16, %v673_v0 }
  0xb0   : > { %v659_v38 = vadd.f32 %v658_v17, %v644_v28 }
  0xb1   : > { %v675_v53 = vadd.f32 %v1139_v1, %v674_v27 }
  0xb2   : > { %v660_v30 = vadd.f32 %v659_v38, %v301_v34 }
  0xb3   : > { %v676_v52 = vadd.f32 %v675_v53, %v302_v29 }
  0xb4   : > { %677 = vst [vmem:[#allocation2] sm:$0xff] %v660_v30 }
  0xb5   : > { %678 = vst [vmem:[#allocation3] sm:$0xff] %v676_v52 }
  0xb6 PF: > { %p1140_p6 = scmp.ge.s32.totalorder %s1505_s17, 0 }
  0xb8   : > { %682 = sbr.rel (%p1140_p6) target bundleno = 253 (0xfd), region = 48 }
  0xbd   : > { %v685_v57 = vld [vmem:[%s1646_s5] sm:$0xff]  ;;  %v686_v5 = vld [vmem:[%s1646_s5 + $0x8] sm:$0xff]  ;;  %v687_v32 = vld [vmem:[%s1646_s5 + $0x10] sm:$0xff]  ;;  %v1523_v28 = vmov 0.0  }
  0xbe   : > { %v765_v51 = vsub.f32 1.0, %v685_v57  ;;  %v766_v39 = vsub.f32 1.0, %v686_v5  ;;  %v701_v40 = vld [vmem:[%s1652_s6] sm:$0xff]  ;;  %v702_v48 = vld [vmem:[%s1652_s6 + $0x8] sm:$0xff]  ;;  %v2377_v58 = vld [vmem:[%s1652_s6 + $0x10] sm:$0xff]  ;;  %v767_v31 = vsub.f32 1.0, %v687_v32 }
  0xbf   : > { %vm717_vm15 = vcmp.ge.f32.partialorder %v701_v40, 0.6  ;;  %v688_v61 = vld [vmem:[%s1646_s5 + $0x18] sm:$0xff]  ;;  %v689_v24 = vld [vmem:[%s1646_s5 + $0x20] sm:$0xff]  ;;  %vm718_vm4 = vcmp.ge.f32.partialorder %v702_v48, 0.6 }
  0xc0   : > { %v781_v59 = vsel %vm717_vm15, %v685_v57, %v765_v51  ;;  %v690_v46 = vld [vmem:[%s1646_s5 + $0x28] sm:$0xff]  ;;  %v2384_v20 = vld [vmem:[%s1646_s5 + $0x30] sm:$0xff]  ;;  %v2387_v63 = vld [vmem:[%s1646_s5 + $0x38] sm:$0xff]  ;;  %vm719_vm8 = vcmp.ge.f32.partialorder %v2377_v58, 0.6  ;;  %v782_v26 = vsel %vm718_vm4, %v686_v5, %v766_v39  ;;  %v768_v21 = vsub.f32 1.0, %v688_v61 }
  0xc1   : > { %1290 = vlog2.f32 %v781_v59  ;;  %v2392_v6 = vld [vmem:[%s1646_s5 + $0x40] sm:$0xff]  ;;  %v2395_v36 = vld [vmem:[%s1646_s5 + $0x48] sm:$0xff]  ;;  %v2398_v18 = vld [vmem:[%s1646_s5 + $0x50] sm:$0xff]  ;;  %v783_v2 = vsel %vm719_vm8, %v687_v32, %v767_v31  ;;  %v769_v9 = vsub.f32 1.0, %v689_v24  ;;  %v770_v35 = vsub.f32 1.0, %v690_v46 }
  0xc2   : > { %1292 = vlog2.f32 %v782_v26  ;;  %v2403_v3 = vld [vmem:[%s1646_s5 + $0x58] sm:$0xff]  ;;  %v2406_v56 = vld [vmem:[%s1646_s5 + $0x60] sm:$0xff]  ;;  %v2409_v60 = vld [vmem:[%s1646_s5 + $0x68] sm:$0xff]  ;;  %v771_v50 = vsub.f32 1.0, %v2384_v20  ;;  %v772_v8 = vsub.f32 1.0, %v2387_v63  ;;  %v773_v42 = vsub.f32 1.0, %v2392_v6 }
  0xc3   : > { %1294 = vlog2.f32 %v783_v2  ;;  %v2413_v12 = vld [vmem:[%s1646_s5 + $0x70] sm:$0xff]  ;;  %v704_v62 = vld [vmem:[%s1652_s6 + $0x18] sm:$0xff]  ;;  %v774_v19 = vsub.f32 1.0, %v2395_v36  ;;  %v775_v22 = vsub.f32 1.0, %v2398_v18  ;;  %v705_v43 = vld [vmem:[%s1652_s6 + $0x20] sm:$0xff]  ;;  %v776_v41 = vsub.f32 1.0, %v2403_v3 }
  0xc4   : > { %v706_v11 = vld [vmem:[%s1652_s6 + $0x28] sm:$0xff]  ;;  %v2423_v23 = vld [vmem:[%s1652_s6 + $0x30] sm:$0xff]  ;;  %v777_v47 = vsub.f32 1.0, %v2406_v56  ;;  %v778_v54 = vsub.f32 1.0, %v2409_v60  ;;  %v2429_v14 = vld [vmem:[%s1652_s6 + $0x38] sm:$0xff]  ;;  %v779_v37 = vsub.f32 1.0, %v2413_v12 }
  0xc5   : > { %v2432_v44 = vld [vmem:[%s1652_s6 + $0x40] sm:$0xff]  ;;  %vm733_vm11 = vcmp.le.f32.partialorder %v701_v40, 0.45  ;;  %vm734_vm12 = vcmp.le.f32.partialorder %v702_v48, 0.45  ;;  %v2435_v13 = vld [vmem:[%s1652_s6 + $0x48] sm:$0xff] }
  0xc6   : > { %v2438_v10 = vld [vmem:[%s1652_s6 + $0x50] sm:$0xff]  ;;  %v2441_v33 = vld [vmem:[%s1652_s6 + $0x58] sm:$0xff]  ;;  %vm720_vm2 = vcmp.ge.f32.partialorder %v704_v62, 0.6  ;;  %v2445_v49 = vld [vmem:[%s1652_s6 + $0x60] sm:$0xff] }
  0xc7   : > { %v2448_v4 = vld [vmem:[%s1652_s6 + $0x68] sm:$0xff]  ;;  %vm721_vm1 = vcmp.ge.f32.partialorder %v705_v43, 0.6  ;;  %vm735_vm10 = vcmp.le.f32.partialorder %v2377_v58, 0.45  ;;  %vm2452_vm14 = vmor %vm717_vm15, %vm733_vm11  ;;  %v784_v7 = vsel %vm720_vm2, %v688_v61, %v768_v21  ;;  %v2510_v39 = vld [vmem:[%s1652_s6 + $0x70] sm:$0xff] }
  0xc8   : > { %vm723_vm0 = vcmp.ge.f32.partialorder %v2423_v23, 0.6  ;;  %vm2459_vm9 = vmor %vm718_vm4, %vm734_vm12  ;;  %vm725_vm3 = vcmp.ge.f32.partialorder %v2432_v44, 0.6  ;;  %vm726_vm13 = vcmp.ge.f32.partialorder %v2435_v13, 0.6  ;;  %v785_v16 = vsel %vm721_vm1, %v689_v24, %v769_v9 }
  0xc9   : > { %vm736_vm5 = vcmp.le.f32.partialorder %v704_v62, 0.45  ;;  %vm2809_vm15 = vcmp.ge.f32.partialorder %v2438_v10, 0.6  ;;  %vm737_vm7 = vcmp.le.f32.partialorder %v705_v43, 0.45  ;;  %vm2470_vm6 = vmor %vm719_vm8, %vm735_vm10  ;;  %v787_v27 = vsel %vm723_vm0, %v2384_v20, %v771_v50 }
  0xca   : > { %vm729_vm4 = vcmp.ge.f32.partialorder %v2445_v49, 0.6  ;;  %vm2938_vm12 = vcmp.ge.f32.partialorder %v706_v11, 0.6  ;;  %v1141_v0 = vsel %vm2452_vm14, 1.0, %v1523_v28  ;;  %v1142_v1 = vsel %vm2459_vm9, 1.0, %v1523_v28  ;;  %vm2486_vm11 = vmor %vm720_vm2, %vm736_vm5 }
  0xcb   : > { %v786_v45 = vsel %vm2938_vm12, %v690_v46, %v770_v35  ;;  %vm738_vm10 = vcmp.le.f32.partialorder %v706_v11, 0.45  ;;  %vm2941_vm12 = vcmp.ge.f32.partialorder %v2429_v14, 0.6  ;;  %vm2498_vm8 = vmor %vm721_vm1, %vm737_vm7  ;;  %v1143_v30 = vsel %vm2470_vm6, 1.0, %v1523_v28  ;;  %v2552_v2 = vld [vmem:[%s1652_s6 + $0x78] sm:$0xff] }
  0xcc   : > { %v788_v29 = vsel %vm2941_vm12, %v2387_v63, %v772_v8  ;;  %1296 = vlog2.f32 %v784_v7  ;;  %v909_v57 = vadd.f32 %v1142_v1, %v1141_v0  ;;  %vm739_vm2 = vcmp.le.f32.partialorder %v2423_v23, 0.45 }
  0xcd   : > { %v789_v32 = vsel %vm725_vm3, %v2392_v6, %v773_v42  ;;  %1298 = vlog2.f32 %v785_v16  ;;  %vm740_vm1 = vcmp.le.f32.partialorder %v2429_v14, 0.45  ;;  %v790_v40 = vsel %vm726_vm13, %v2395_v36, %v774_v19  ;;  %vm2535_vm12 = vmor %vm723_vm0, %vm739_vm2  ;;  %v700_v36 = vld [vmem:[%s1646_s5 + $0x78] sm:$0xff] }
  0xce   : > { %v1291_v17 = vpop.eup %1290  ;;  %v1144_v48 = vsel %vm2486_vm11, 1.0, %v1523_v28  ;;  %1300 = vlog2.f32 %v786_v45  ;;  %vm2944_vm7 = vcmp.ge.f32.partialorder %v706_v11, 0.6  ;;  %v791_v31 = vsel %vm2809_vm15, %v2398_v18, %v775_v22 }
  0xcf   : > { %v1293_v38 = vpop.eup %1292  ;;  %v830_v52 = vmul.f32 0.6931472, %v1291_v17  ;;  %vm2521_vm5 = vmor %vm2944_vm7, %vm738_vm10  ;;  %v1145_v61 = vsel %vm2498_vm8, 1.0, %v1523_v28  ;;  %1302 = vlog2.f32 %v787_v27  ;;  %v910_v24 = vadd.f32 %v1143_v30, %v909_v57 }
  0xd0   : > { %v1295_v5 = vpop.eup %1294  ;;  %v832_v51 = vmul.f32 0.6931472, %v1293_v38  ;;  %1304 = vlog2.f32 %v788_v29  ;;  %vm2949_vm7 = vcmp.ge.f32.partialorder %v2441_v33, 0.6  ;;  %vm741_vm0 = vcmp.le.f32.partialorder %v2432_v44, 0.45 }
  0xd1   : > { %v834_v46 = vmul.f32 0.6931472, %v1295_v5  ;;  %v861_v20 = vmax.f32 %v830_v52, -100.0  ;;  %v792_v26 = vsel %vm2949_vm7, %v2403_v3, %v776_v41  ;;  %1306 = vlog2.f32 %v789_v32 }
  0xd2   : > { %v862_v63 = vmax.f32 %v832_v51, -100.0  ;;  %v911_v6 = vadd.f32 %v1144_v48, %v910_v24  ;;  %vm742_vm2 = vcmp.le.f32.partialorder %v2435_v13, 0.45  ;;  %v1146_v18 = vsel %vm2521_vm5, 1.0, %v1523_v28 }
  0xd3   : > { %1308 = vlog2.f32 %v790_v40  ;;  %vm2950_vm15 = vcmp.ge.f32.partialorder %v2429_v14, 0.6  ;;  %v793_v21 = vsel %vm729_vm4, %v2406_v56, %v777_v47  ;;  %v1147_v9 = vsel %vm2535_vm12, 1.0, %v1523_v28 }
  0xd4   : > { %vm2558_vm10 = vmor %vm2950_vm15, %vm740_vm1  ;;  %1310 = vlog2.f32 %v791_v31  ;;  %v912_v35 = vadd.f32 %v1145_v61, %v911_v6  ;;  %v863_v50 = vmax.f32 %v834_v46, -100.0  ;;  %v877_v62 = vsel %vm2452_vm14, %v861_v20, 0.0 }
  0xd5   : > { %1312 = vlog2.f32 %v792_v26  ;;  %v878_v8 = vsel %vm2459_vm9, %v862_v63, 0.0  ;;  %vm2576_vm15 = vmor %vm725_vm3, %vm741_vm0  ;;  %v780_v56 = vsub.f32 1.0, %v700_v36  ;;  %vm2955_vm1 = vcmp.ge.f32.partialorder %v2448_v4, 0.6 }
  0xd6   : > { %v794_v19 = vsel %vm2955_vm1, %v2409_v60, %v778_v54  ;;  %v913_v22 = vadd.f32 %v1146_v18, %v912_v35  ;;  %vm2810_vm7 = vcmp.ge.f32.partialorder %v2552_v2, 0.6  ;;  %v1148_v43 = vsel %vm2558_vm10, 1.0, %v1523_v28  ;;  %vm2594_vm9 = vmor %vm726_vm13, %vm742_vm2 }
  0xd7   : > { %1314 = vlog2.f32 %v793_v21  ;;  %vm743_vm14 = vcmp.le.f32.partialorder %v2438_v10, 0.45  ;;  %vm2958_vm3 = vcmp.ge.f32.partialorder %v2510_v39, 0.6  ;;  %v893_v23 = vadd.f32 %v878_v8, %v877_v62 }
  0xd8   : > { %v795_v60 = vsel %vm2958_vm3, %v2413_v12, %v779_v37  ;;  %v914_v41 = vadd.f32 %v1147_v9, %v913_v22  ;;  %vm744_vm0 = vcmp.le.f32.partialorder %v2441_v33, 0.45  ;;  %v1149_v47 = vsel %vm2576_vm15, 1.0, %v1523_v28 }
  0xd9   : > { %1316 = vlog2.f32 %v794_v19  ;;  %v879_v54 = vsel %vm2470_vm6, %v863_v50, 0.0  ;;  %v1297_v14 = vpop.eup %1296  ;;  %v796_v44 = vsel %vm2810_vm7, %v700_v36, %v780_v56  ;;  %vm745_vm13 = vcmp.le.f32.partialorder %v2445_v49, 0.45 }
  0xda   : > { %v915_v13 = vadd.f32 %v1148_v43, %v914_v41  ;;  %v1299_v25 = vpop.eup %1298  ;;  %vm2959_vm2 = vcmp.ge.f32.partialorder %v2438_v10, 0.6  ;;  %v1150_v37 = vsel %vm2594_vm9, 1.0, %v1523_v28  ;;  %v836_v55 = vmul.f32 0.6931472, %v1297_v14 }
  0xdb   : > { %vm2614_vm1 = vmor %vm2959_vm2, %vm743_vm14  ;;  %1318 = vlog2.f32 %v795_v60  ;;  %v1301_v7 = vpop.eup %1300  ;;  %vm746_vm6 = vcmp.le.f32.partialorder %v2448_v4, 0.45  ;;  %vm2962_vm3 = vcmp.ge.f32.partialorder %v2441_v33, 0.6  ;;  %v838_v10 = vmul.f32 0.6931472, %v1299_v25 }
  0xdc   : > { %vm2626_vm7 = vmor %vm2962_vm3, %vm744_vm0  ;;  %v894_v16 = vadd.f32 %v893_v23, %v879_v54  ;;  %v916_v45 = vadd.f32 %v1149_v47, %v915_v13  ;;  %v1303_v0 = vpop.eup %1302  ;;  %vm747_vm14 = vcmp.le.f32.partialorder %v2510_v39, 0.45  ;;  %v840_v1 = vmul.f32 0.6931472, %v1301_v7 }
  0xdd   : > { %1320 = vlog2.f32 %v796_v44  ;;  %v864_v17 = vmax.f32 %v836_v55, -100.0  ;;  %v1305_v27 = vpop.eup %1304  ;;  %v1151_v29 = vsel %vm2614_vm1, 1.0, %v1523_v28  ;;  %v842_v38 = vmul.f32 0.6931472, %v1303_v0  ;;  %vm2638_vm0 = vmor %vm729_vm4, %vm745_vm13 }
  0xde   : > { %v865_v33 = vmax.f32 %v838_v10, -100.0  ;;  %v917_v30 = vadd.f32 %v1150_v37, %v916_v45  ;;  %v1307_v52 = vpop.eup %1306  ;;  %v1152_v5 = vsel %vm2626_vm7, 1.0, %v1523_v28  ;;  %v844_v32 = vmul.f32 0.6931472, %v1305_v27  ;;  %v684_v10 = vld [vmem:[#allocation3] sm:$0xff] }
  0xdf   : > { %v866_v51 = vmax.f32 %v840_v1, -100.0  ;;  %v880_v40 = vsel %vm2486_vm11, %v864_v17, 0.0  ;;  %v846_v31 = vmul.f32 0.6931472, %v1307_v52  ;;  %v867_v61 = vmax.f32 %v842_v38, -100.0 }
  0xe0   : > { %v1309_v48 = vpop.eup %1308  ;;  %v881_v24 = vsel %vm2498_vm8, %v865_v33, 0.0  ;;  %v895_v49 = vadd.f32 %v894_v16, %v880_v40  ;;  %vm2967_vm4 = vcmp.ge.f32.partialorder %v2448_v4, 0.6  ;;  %v868_v26 = vmax.f32 %v844_v32, -100.0 }
  0xe1   : > { %v1311_v46 = vpop.eup %1310  ;;  %vm2653_vm13 = vmor %vm2967_vm4, %vm746_vm6  ;;  %v848_v63 = vmul.f32 0.6931472, %v1309_v48  ;;  %v882_v34 = vsel %vm2521_vm5, %v866_v51, 0.0  ;;  %v918_v6 = vadd.f32 %v1151_v29, %v917_v30  ;;  %vm748_vm11 = vcmp.le.f32.partialorder %v2552_v2, 0.45 }
  0xe2   : > { %v1313_v36 = vpop.eup %1312  ;;  %v1153_v53 = vsel %vm2638_vm0, 1.0, %v1523_v28  ;;  %v896_v18 = vadd.f32 %v895_v49, %v881_v24  ;;  %vm2970_vm8 = vcmp.ge.f32.partialorder %v2510_v39, 0.6  ;;  %v850_v21 = vmul.f32 0.6931472, %v1311_v46 }
  0xe3   : > { %vm2667_vm2 = vmor %vm2970_vm8, %vm747_vm14  ;;  %v869_v58 = vmax.f32 %v846_v31, -100.0  ;;  %v883_v9 = vsel %vm2535_vm12, %v867_v61, 0.0  ;;  %v919_v35 = vadd.f32 %v1152_v5, %v918_v6  ;;  %v1154_v62 = vsel %vm2653_vm13, 1.0, %v1523_v28  ;;  %v683_v31 = vld [vmem:[#allocation2] sm:$0xff] }
  0xe4   : > { %v1315_v50 = vpop.eup %1314  ;;  %v897_v8 = vadd.f32 %v896_v18, %v882_v34  ;;  %vm2973_vm5 = vcmp.ge.f32.partialorder %v2552_v2, 0.6  ;;  %v852_v56 = vmul.f32 0.6931472, %v1313_v36  ;;  %v870_v19 = vmax.f32 %v848_v63, -100.0 }
  0xe5   : > { %vm2678_vm6 = vmor %vm2973_vm5, %vm748_vm11  ;;  %v884_v22 = vsel %vm2558_vm10, %v868_v26, 0.0  ;;  %v920_v59 = vadd.f32 %v1153_v53, %v919_v35  ;;  %v1155_v60 = vsel %vm2667_vm2, 1.0, %v1523_v28  ;;  %v854_v41 = vmul.f32 0.6931472, %v1315_v50 }
  0xe6   : > { %v1317_v43 = vpop.eup %1316  ;;  %v898_v23 = vadd.f32 %v897_v8, %v883_v9  ;;  %v871_v47 = vmax.f32 %v850_v21, -100.0  ;;  %v885_v2 = vsel %vm2576_vm15, %v869_v58, 0.0  ;;  %v1156_v44 = vsel %vm2678_vm6, 1.0, %v1523_v28 }
  0xe7   : > { %v921_v54 = vadd.f32 %v1154_v62, %v920_v59  ;;  %v856_v13 = vmul.f32 0.6931472, %v1317_v43  ;;  %v872_v25 = vmax.f32 %v852_v56, -100.0  ;;  %v886_v37 = vsel %vm2594_vm9, %v870_v19, 0.0 }
  0xe8   : > { %v1319_v14 = vpop.eup %1318  ;;  %v899_v3 = vadd.f32 %v898_v23, %v884_v22  ;;  %v873_v0 = vmax.f32 %v854_v41, -100.0  ;;  %v887_v42 = vsel %vm2614_vm1, %v871_v47, 0.0 }
  0xe9   : > { %v922_v55 = vadd.f32 %v1155_v60, %v921_v54  ;;  %v858_v45 = vmul.f32 0.6931472, %v1319_v14  ;;  %v874_v29 = vmax.f32 %v856_v13, -100.0  ;;  %v888_v28 = vsel %vm2626_vm7, %v872_v25, 0.0 }
  0xea   : > { %v1321_v7 = vpop.eup %1320  ;;  %v900_v16 = vadd.f32 %v899_v3, %v885_v2  ;;  %v889_v30 = vsel %vm2638_vm0, %v873_v0, 0.0 }
  0xeb   : > { %v923_v1 = vadd.f32 %v1156_v44, %v922_v55  ;;  %v860_v27 = vmul.f32 0.6931472, %v1321_v7  ;;  %v875_v11 = vmax.f32 %v858_v45, -100.0  ;;  %v890_v12 = vsel %vm2653_vm13, %v874_v29, 0.0 }
  0xec   : > { %v901_v17 = vadd.f32 %v900_v16, %v886_v37 }
  0xed   : > { %v924_v38 = vadd.f32 %v923_v1, %v684_v10  ;;  %v876_v5 = vmax.f32 %v860_v27, -100.0  ;;  %v891_v51 = vsel %vm2667_vm2, %v875_v11, 0.0 }
  0xee   : > { %v902_v33 = vadd.f32 %v901_v17, %v887_v42 }
  0xef   : > { %926 = vst [vmem:[#allocation3] sm:$0xff] %v924_v38  ;;  %v892_v15 = vsel %vm2678_vm6, %v876_v5, 0.0 }
  0xf0   : > { %v903_v52 = vadd.f32 %v902_v33, %v888_v28 }
  0xf2   : > { %v904_v32 = vadd.f32 %v903_v52, %v889_v30 }
  0xf4   : > { %v905_v40 = vadd.f32 %v904_v32, %v890_v12 }
  0xf6   : > { %v906_v48 = vadd.f32 %v905_v40, %v891_v51 }
  0xf8   : > { %v907_v61 = vadd.f32 %v906_v48, %v892_v15 }
  0xfa   : > { %v908_v24 = vadd.f32 %v907_v61, %v683_v31 }
  0xfc   : > { %925 = vst [vmem:[#allocation2] sm:$0xff] %v908_v24 }
  0xfd PF: > { %v932_v49 = vld [vmem:[#allocation3] sm:$0xff]  ;;  %s1159_s10 = sshll.u32 %s1505_s17, 7  ;;  %s953_s20 = sshll.u32 %s1662_s9, 4  ;;  %s954_s20 = int_to_ptr.vmem [resolvable:$true] %s953_s20 }
  0xfe   : > { %933 = vst [vmem:[%s1664_s4] sm:$0xff] %v932_v49  ;;  %s951_s15 = scalar_lea.hbm %s2777_s2, %s1159_s10  ;;  %s935_s21 = scalar_lea.sflag [#allocation6], %s1659_s7 }
  0xff   : > { %s1374_s25 = scalar_lea.vmem %s954_s20, 128  ;;  %s1524_s26 = smov [#allocation9]  }
 0x100   : > { %p1375_p2 = scmp.ne.s32.totalorder %s954_s20, %s1374_s25  ;;  %s1378_s5 = sshll.u32 %s1524_s26, 4  ;;  %s1379_s5 = int_to_ptr.vmem [resolvable:$false] %s1378_s5 }
 0x101   : > { %s1380_s30 = scalar_lea.vmem %s1379_s5, 256  ;;  %p1381_p4 = scmp.lt.s32.totalorder %s954_s20, %s1379_s5 }
 0x102   : > { %p1376_p3 = pnand %p1375_p2, %p1610_p12  ;;  %p1382_p7 = scmp.lt.s32.totalorder %s1380_s30, %s1374_s25 }
 0x103   : > { %v930_v57 = vld [vmem:[#allocation2] sm:$0xff] }
 0x104   : > { %931 = vst [vmem:[%s1662_s9] sm:$0xff] %v930_v57  ;;  %p1377_p5 = pneg %p1376_p3  ;;  %p1383_p8 = por %p1382_p7, %p1381_p4 }
 0x106   : > { %p1384_p9 = pnand %p1383_p8, %p1377_p5 }
 0x108   : > { %1387 = shalt.err (!%p1384_p9)
}
 0x109   : > { %s1388_s6 = scalar_lea.hbm %s951_s15, 128  ;;  %s1392_s24 = scalar_lea.hbm %s2777_s2, 256 }
 0x10a   : > { %p1389_p10 = scmp.ne.s32.totalorder %s951_s15, %s1388_s6  ;;  %p1393_p6 = scmp.lt.s32.totalorder %s951_s15, %s2777_s2 }
 0x10b   : > { %p1394_p2 = scmp.lt.s32.totalorder %s1392_s24, %s1388_s6 }
 0x10c   : > { %p1390_p11 = pnand %p1389_p10, %p1610_p12 }
 0x10d   : > { %p1395_p3 = por %p1394_p2, %p1393_p6 }
 0x10e   : > { %p1391_p1 = pneg %p1390_p11 }
 0x110   : > { %p1396_p0 = pnand %p1395_p3, %p1391_p1 }
 0x112   : > { %1399 = shalt.err (!%p1396_p0)
}
 0x113   : > { %1167 = dma.vmem_to_hbm [thread:$0]  (%p1610_p12), %s954_s20, 128, %s951_s15, %s935_s21  }
 0x114   : > { %s964_s5 = scalar_lea.hbm %s2778_s3, %s1159_s10  ;;  %s966_s30 = sshll.u32 %s1664_s4, 4  ;;  %s967_s30 = int_to_ptr.vmem [resolvable:$true] %s966_s30 }
 0x115   : > { %s940_s8 = scalar_lea.sflag [#allocation11], %s1659_s7  ;;  %s1400_s9 = scalar_lea.vmem %s967_s30, 128 }
 0x116   : > { %p1401_p5 = scmp.ne.s32.totalorder %s967_s30, %s1400_s9  ;;  %s1525_s6 = smov [#allocation10]  }
 0x117   : > { %s1404_s24 = sshll.u32 %s1525_s6, 4  ;;  %s1405_s24 = int_to_ptr.vmem [resolvable:$false] %s1404_s24 }
 0x118   : > { %p1402_p4 = pnand %p1401_p5, %p1610_p12  ;;  %s1406_s23 = scalar_lea.vmem %s1405_s24, 256 }
 0x119   : > { %p1407_p7 = scmp.lt.s32.totalorder %s967_s30, %s1405_s24  ;;  %p1408_p8 = scmp.lt.s32.totalorder %s1406_s23, %s1400_s9 }
 0x11a   : > { %p1403_p0 = pneg %p1402_p4 }
 0x11b   : > { %p1409_p9 = por %p1408_p8, %p1407_p7 }
 0x11d   : > { %p1410_p10 = pnand %p1409_p9, %p1403_p0 }
 0x11f   : > { %1413 = shalt.err (!%p1410_p10)
}
 0x120   : > { %s1414_s17 = scalar_lea.hbm %s964_s5, 128  ;;  %s1418_s10 = scalar_lea.hbm %s2778_s3, 256 }
 0x121   : > { %p1415_p11 = scmp.ne.s32.totalorder %s964_s5, %s1414_s17  ;;  %p1419_p2 = scmp.lt.s32.totalorder %s964_s5, %s2778_s3 }
 0x122   : > { %p1420_p3 = scmp.lt.s32.totalorder %s1418_s10, %s1414_s17 }
 0x123   : > { %p1416_p1 = pnand %p1415_p11, %p1610_p12 }
 0x124   : > { %p1421_p5 = por %p1420_p3, %p1419_p2 }
 0x125   : > { %p1417_p6 = pneg %p1416_p1 }
 0x127   : > { %p1422_p4 = pnand %p1421_p5, %p1417_p6 }
 0x129   : > { %1425 = shalt.err (!%p1422_p4)
}
 0x12a   : > { %1168 = dma.vmem_to_hbm [thread:$0]  (%p1610_p12), %s967_s30, 128, %s964_s5, %s940_s8  }
 0x12b PF: > { %s978_s21 = sand.u32 1, %s1485_s12   ;;  %p2976_p0 = scmp.ge.s32.totalorder %s1513_s19, 2 }
 0x12c   : > { %s979_s11 = scalar_lea.sflag [#allocation6], %s978_s21 }
 0x12d   : > { %p1172_p7 = pnand %p2976_p0, %p1614_p13 }
 0x12f   : > { %p1173_p8 = pneg %p1172_p7 }
 0x131   : > { %1471 = dma.done.wait (%p1173_p8), %s979_s11, 128  }
 0x132   : > { %1473 = vsyncadd (%p1173_p8), %s979_s11, 4294967168  ;;  %s988_s25 = scalar_lea.sflag [#allocation11], %s978_s21 }
 0x133   : > { %1475 = dma.done.wait (%p1173_p8), %s988_s25, 128  }
 0x134   : > { %1477 = vsyncadd (%p1173_p8), %s988_s25, 4294967168  ;;  %s26_s19 = sadd.s32 1, %s1513_s19   ;;  %s2977_s12 = smov %s1489_s13 }
 0x135   : > { %p23_p9 = scmp.ge.s32.totalorder %s26_s19, 4   ;;  %s2978_s13 = smov %s1493_s14 }
 0x136   : > { %s2979_s14 = smov %s1604_s27  ;;  %s2980_s15 = smov %s1501_s16 }
 0x137   : > { %s2765_s16 = smov 0   ;;  %s2981_s17 = smov %s1509_s18 }
 0x138   : > { %s2982_s18 = smov %s2984_s22  ;;  %25 = sbr.rel (!%p23_p9) target bundleno = 11 (0xb), region = 119 }
 0x13d   :  { %993 = vsyncpa [#allocation5], 1 }
 0x13e   :  { %995 = vsyncpa [#allocation5 + $0x1], 1 }
 0x13f   :  { %996 = vsyncpa [#allocation8], 1 }
 0x140   :  { %998 = vsyncpa [#allocation8 + $0x1], 1 }
 0x141   :  { %999 = vsyncpa [#allocation6], 1 }
 0x142   :  { %1001 = vsyncpa [#allocation6 + $0x1], 1 }
 0x143   :  { %1002 = vsyncpa [#allocation11], 1 }
 0x144   :  { %1004 = vsyncpa [#allocation11 + $0x1], 1 }

</bundles_post_ra>
